<compile_context>
chip_gen: v5e
topology: v5e:2x2
jax: 0.10.0
libtpu: 0.0.40
codegen_flags: <defaults>
</compile_context>

<pallas_src>
import math
import jax
import jax.numpy as jnp
from jax import lax
from jax.experimental import pallas as pl
from jax.experimental.pallas import tpu as pltpu  # noqa: F401  (TPU backend)

# ----------------------------- model config ---------------------------------
B = 2            # batch
S = 8            # sequence length
D_MODEL = 32     # d_model (== input feature size for this module)
NHEAD = 4
HEAD_DIM = D_MODEL // NHEAD
DIM_FF = 64
NUM_LAYERS = 2
OUTPUT_SIZE = 1
OUT_PAD = 128    # lane-dense padded width of the final output store

LN_EPS = 1e-5                      # python float -> inlined literal
SQRT_D = float(math.sqrt(D_MODEL))  # python float -> inlined literal

# packed weight-slab row layout (per layer, 96 lanes wide)
R_QKV = 0                       # rows   0: 32  -> W_qkv (32, 96)  (Q pre-scaled)
R_OUT = D_MODEL                 # rows  32: 64  -> W_out (32, 32)
R_FF1 = 2 * D_MODEL             # rows  64: 96  -> W1    (32, 64)
R_FF2 = 3 * D_MODEL             # rows  96:160  -> W2    (64, 32)
R_VEC = 3 * D_MODEL + DIM_FF    # rows 160:168  -> biases / LN params (8 rows)
W_ROWS = R_VEC + 8              # 168
W_COLS = 3 * D_MODEL            # 96

NF = NHEAD * B * S              # 64 folded attention rows (head, batch, seq)
C_ROWS = NF + B * S             # consts slab: mask (64,64) + pe_flat (16,32)
C_COLS = NF

D_ROWS = D_MODEL + 8            # decoder slab: rows 0:32 = W_dec, row 32 = b_dec


def _layer_norm(x, w, b):
    mean = jnp.mean(x, axis=-1, keepdims=True)
    var = jnp.mean((x - mean) ** 2, axis=-1, keepdims=True)
    return (x - mean) * lax.rsqrt(var + LN_EPS) * w + b


# --------------------- single fused forward-pass kernel ---------------------
def _fused_forward_kernel(x_ref, c_ref, w_ref, d_ref, o_ref):
    n = B * S                                   # 16 token rows

    mask = c_ref[0:NF, :]                       # (64, 64) block-diag additive mask
    pe = c_ref[NF:NF + n, 0:D_MODEL]            # (16, 32) PE rows (batch-indexed quirk)

    # src * sqrt(d_model) + positional encoding
    x = x_ref[...] * SQRT_D + pe                # (16, 32)

    for l in range(NUM_LAYERS):
        # -------- static views into the packed per-layer weight slab --------
        w_qkv = w_ref[l, R_QKV:R_QKV + D_MODEL, :]                    # (32, 96)
        w_out = w_ref[l, R_OUT:R_OUT + D_MODEL, 0:D_MODEL]            # (32, 32)
        w1 = w_ref[l, R_FF1:R_FF1 + D_MODEL, 0:DIM_FF]                # (32, 64)
        w2 = w_ref[l, R_FF2:R_FF2 + DIM_FF, 0:D_MODEL]                # (64, 32)
        vecs = w_ref[l, R_VEC:R_VEC + 8, :]                           # (8, 96)
        b_qkv = vecs[0:1, :]                                          # (1, 96)
        b_out = vecs[1:2, 0:D_MODEL]
        ln1w = vecs[2:3, 0:D_MODEL]
        ln1b = vecs[3:4, 0:D_MODEL]
        b1 = vecs[4:5, 0:DIM_FF]
        b2 = vecs[5:6, 0:D_MODEL]
        ln2w = vecs[6:7, 0:D_MODEL]
        ln2b = vecs[7:8, 0:D_MODEL]

        # -------- fused QKV projection (single MXU push) ---------------------
        # Q columns are pre-scaled by 1/sqrt(head_dim) at pack time.
        qkv = jnp.dot(x, w_qkv, preferred_element_type=jnp.float32) + b_qkv   # (16, 96)

        # -------- fold heads onto sublanes: (B*S, H*HD) -> (H*B*S, HD) -------
        def fold(base):
            return jnp.concatenate(
                [qkv[:, base + h * HEAD_DIM: base + (h + 1) * HEAD_DIM]
                 for h in range(NHEAD)], axis=0)                       # (64, 8)

        q_all = fold(0)
        k_all = fold(D_MODEL)
        v_all = fold(2 * D_MODEL)

        # -------- one block-diagonal attention over all (head,batch) groups --
        s = lax.dot_general(q_all, k_all, (((1,), (1,)), ((), ())),
                            preferred_element_type=jnp.float32)        # (64, 64)
        s = s + mask
        s = s - jnp.max(s, axis=-1, keepdims=True)
        p = jnp.exp(s)
        p = p * pl.reciprocal(jnp.sum(p, axis=-1, keepdims=True), approx=True)
        ctx_all = jnp.dot(p, v_all, preferred_element_type=jnp.float32)  # (64, 8)

        # -------- unfold heads back onto lanes + single output projection ----
        ctx = jnp.concatenate(
            [ctx_all[h * n:(h + 1) * n, :] for h in range(NHEAD)], axis=1)  # (16, 32)
        attn = jnp.dot(ctx, w_out, preferred_element_type=jnp.float32) + b_out

        # TODO(synk): dropout (p=0.1) inside the encoder layer is identity (eval mode).

        # -------- residual + LayerNorm 1 (post-norm) --------------------------
        y = _layer_norm(x + attn, ln1w, ln1b)

        # -------- feed-forward: linear1 -> relu -> linear2 --------------------
        h1 = jnp.maximum(jnp.dot(y, w1, preferred_element_type=jnp.float32) + b1, 0.0)
        ff = jnp.dot(h1, w2, preferred_element_type=jnp.float32) + b2

        # -------- residual + LayerNorm 2 --------------------------------------
        x = _layer_norm(y + ff, ln2w, ln2b)

    # ---- decoder head on the LAST timestep of each batch element only ------
    x_last = jnp.concatenate(
        [x[b * S + S - 1: b * S + S, :] for b in range(B)], axis=0)     # (B, 32)
    dec_w = d_ref[0:D_MODEL, :]                                         # (32, 128)
    dec_b = d_ref[D_MODEL:D_MODEL + 1, :]                               # (1, 128)
    o_ref[...] = jnp.dot(x_last, dec_w,
                         preferred_element_type=jnp.float32) + dec_b    # (B, 128)


# ------------------------------ parameters ----------------------------------
def make_positional_encoding(max_len, d_model):
    position = jnp.arange(max_len, dtype=jnp.float32)[:, None]
    div_term = jnp.exp(jnp.arange(0, d_model, 2, dtype=jnp.float32)
                       * (-math.log(10000.0) / d_model))
    pe = jnp.zeros((max_len, d_model), dtype=jnp.float32)
    pe = pe.at[:, 0::2].set(jnp.sin(position * div_term))
    pe = pe.at[:, 1::2].set(jnp.cos(position * div_term))
    return pe  # (max_len, d_model)


def init_params(key):
    def nrm(k, shape, scale=0.05):
        return scale * jax.random.normal(k, shape, dtype=jnp.float32)

    layers = []
    for l in range(NUM_LAYERS):
        keys = jax.random.split(jax.random.fold_in(key, l), 6)
        layers.append(dict(
            w_qkv=nrm(keys[0], (D_MODEL, 3 * D_MODEL)),   # = torch in_proj_weight.T
            b_qkv=nrm(keys[1], (3 * D_MODEL,)),
            w_out=nrm(keys[2], (D_MODEL, D_MODEL)),
            b_out=nrm(keys[3], (D_MODEL,)),
            ln1_w=jnp.ones((D_MODEL,), jnp.float32),
            ln1_b=jnp.zeros((D_MODEL,), jnp.float32),
            w1=nrm(keys[4], (D_MODEL, DIM_FF)),
            b1=jnp.zeros((DIM_FF,), jnp.float32),
            w2=nrm(keys[5], (DIM_FF, D_MODEL)),
            b2=jnp.zeros((D_MODEL,), jnp.float32),
            ln2_w=jnp.ones((D_MODEL,), jnp.float32),
            ln2_b=jnp.zeros((D_MODEL,), jnp.float32),
        ))
    kd1, kd2 = jax.random.split(jax.random.fold_in(key, 999))
    return dict(
        pe=make_positional_encoding(64, D_MODEL),
        layers=layers,
        dec_w=nrm(kd1, (D_MODEL, OUTPUT_SIZE)),
        dec_b=nrm(kd2, (OUTPUT_SIZE,)),
    )


def pack_params(params):
    """Pack everything the kernel needs into 3 lane-dense f32 slabs (host-side, one-off)."""
    scale = 1.0 / math.sqrt(HEAD_DIM)

    # ---- per-layer weight slab (L, 168, 96) --------------------------------
    slabs = []
    for p in params['layers']:
        w_qkv = p['w_qkv'].at[:, :D_MODEL].multiply(scale)   # fold score scale into Q
        b_qkv = p['b_qkv'].at[:D_MODEL].multiply(scale)
        slab = jnp.zeros((W_ROWS, W_COLS), jnp.float32)
        slab = slab.at[R_QKV:R_QKV + D_MODEL, :].set(w_qkv)
        slab = slab.at[R_OUT:R_OUT + D_MODEL, 0:D_MODEL].set(p['w_out'])
        slab = slab.at[R_FF1:R_FF1 + D_MODEL, 0:DIM_FF].set(p['w1'])
        slab = slab.at[R_FF2:R_FF2 + DIM_FF, 0:D_MODEL].set(p['w2'])
        slab = slab.at[R_VEC + 0, :].set(b_qkv)
        slab = slab.at[R_VEC + 1, 0:D_MODEL].set(p['b_out'])
        slab = slab.at[R_VEC + 2, 0:D_MODEL].set(p['ln1_w'])
        slab = slab.at[R_VEC + 3, 0:D_MODEL].set(p['ln1_b'])
        slab = slab.at[R_VEC + 4, 0:DIM_FF].set(p['b1'])
        slab = slab.at[R_VEC + 5, 0:D_MODEL].set(p['b2'])
        slab = slab.at[R_VEC + 6, 0:D_MODEL].set(p['ln2_w'])
        slab = slab.at[R_VEC + 7, 0:D_MODEL].set(p['ln2_b'])
        slabs.append(slab)
    weights = jnp.stack(slabs, axis=0)

    # ---- consts slab: (head,batch) block-diag mask + PE rows ----------------
    grp = jnp.arange(NF) // S                      # folded row -> (head,batch) group
    mask = jnp.where(grp[:, None] == grp[None, :], 0.0, -1e9).astype(jnp.float32)
    pe_rows = params['pe'][:B]                     # pe[:x.size(0)] quirk (batch index)
    pe_flat = jnp.repeat(pe_rows, S, axis=0)       # (B*S, D) -- row r gets pe[r // S]
    consts = jnp.zeros((C_ROWS, C_COLS), jnp.float32)
    consts = consts.at[0:NF, :].set(mask)
    consts = consts.at[NF:NF + B * S, 0:D_MODEL].set(pe_flat)

    # ---- decoder slab (lane-padded to 128) ----------------------------------
    dec = jnp.zeros((D_ROWS, OUT_PAD), jnp.float32)
    dec = dec.at[0:D_MODEL, 0:OUTPUT_SIZE].set(params['dec_w'])
    dec = dec.at[D_MODEL, 0:OUTPUT_SIZE].set(params['dec_b'])

    return dict(weights=weights, consts=consts, dec=dec)


# ------------------------------ full forward --------------------------------
@jax.jit
def transformer_forward(src, kp):
    x_flat = src.reshape(B * S, D_MODEL)           # (B*S, D)

    out_pad = pl.pallas_call(
        _fused_forward_kernel,
        out_shape=jax.ShapeDtypeStruct((B, OUT_PAD), jnp.float32),
    )(x_flat, kp['consts'], kp['weights'], kp['dec'])

    # kernel already gathered the last timestep per batch element
    return out_pad[:, :OUTPUT_SIZE]                # (B, OUTPUT_SIZE)


if __name__ == "__main__":
    key = jax.random.PRNGKey(0)
    k_in, k_par = jax.random.split(key)
    src = jax.random.normal(k_in, (B, S, D_MODEL), dtype=jnp.float32)

    params = init_params(k_par)
    kparams = pack_params(params)

    out = transformer_forward(src, kparams)
    out = jax.block_until_ready(out)

    assert out.shape == (B, OUTPUT_SIZE), out.shape
    assert bool(jnp.all(jnp.isfinite(out)))
    print("KERNEL_OK")
</pallas_src>

<mosaic_0001>
module attributes {stable_mosaic.version = 11 : i64} {
  func.func @_fused_forward_kernel(%arg0: memref<16x32xf32, #tpu.memory_space<vmem>>, %arg1: memref<80x64xf32, #tpu.memory_space<vmem>>, %arg2: memref<2x168x96xf32, #tpu.memory_space<vmem>>, %arg3: memref<40x128xf32, #tpu.memory_space<vmem>>, %arg4: memref<2x128xf32, #tpu.memory_space<vmem>>) attributes {dimension_semantics = [], scalar_prefetch = 0 : i64, scratch_operands = 0 : i64, tpu.core_type = #tpu.core_type<tc>} {
    %c0 = arith.constant 0 : index
    %c0_0 = arith.constant 0 : index
    %0 = vector.load %arg1[%c0, %c0_0] : memref<80x64xf32, #tpu.memory_space<vmem>>, vector<64x64xf32>
    %c64 = arith.constant 64 : index
    %c0_1 = arith.constant 0 : index
    %1 = vector.load %arg1[%c64, %c0_1] : memref<80x64xf32, #tpu.memory_space<vmem>>, vector<16x32xf32>
    %c0_2 = arith.constant 0 : index
    %c0_3 = arith.constant 0 : index
    %2 = vector.load %arg0[%c0_2, %c0_3] : memref<16x32xf32, #tpu.memory_space<vmem>>, vector<16x32xf32>
    %cst = arith.constant 5.65685415 : f32
    %3 = vector.broadcast %cst : f32 to vector<16x32xf32>
    %4 = arith.mulf %2, %3 : vector<16x32xf32>
    %5 = arith.addf %4, %1 : vector<16x32xf32>
    %c0_4 = arith.constant 0 : index
    %c0_5 = arith.constant 0 : index
    %c0_6 = arith.constant 0 : index
    %6 = vector.load %arg2[%c0_4, %c0_5, %c0_6] : memref<2x168x96xf32, #tpu.memory_space<vmem>>, vector<1x32x96xf32>
    %7 = vector.shape_cast %6 : vector<1x32x96xf32> to vector<32x96xf32>
    %c0_7 = arith.constant 0 : index
    %c32 = arith.constant 32 : index
    %c0_8 = arith.constant 0 : index
    %8 = vector.load %arg2[%c0_7, %c32, %c0_8] : memref<2x168x96xf32, #tpu.memory_space<vmem>>, vector<1x32x32xf32>
    %9 = vector.shape_cast %8 : vector<1x32x32xf32> to vector<32x32xf32>
    %c0_9 = arith.constant 0 : index
    %c64_10 = arith.constant 64 : index
    %c0_11 = arith.constant 0 : index
    %10 = vector.load %arg2[%c0_9, %c64_10, %c0_11] : memref<2x168x96xf32, #tpu.memory_space<vmem>>, vector<1x32x64xf32>
    %11 = vector.shape_cast %10 : vector<1x32x64xf32> to vector<32x64xf32>
    %c0_12 = arith.constant 0 : index
    %c96 = arith.constant 96 : index
    %c0_13 = arith.constant 0 : index
    %12 = vector.load %arg2[%c0_12, %c96, %c0_13] : memref<2x168x96xf32, #tpu.memory_space<vmem>>, vector<1x64x32xf32>
    %13 = vector.shape_cast %12 : vector<1x64x32xf32> to vector<64x32xf32>
    %c0_14 = arith.constant 0 : index
    %c160 = arith.constant 160 : index
    %c0_15 = arith.constant 0 : index
    %14 = vector.load %arg2[%c0_14, %c160, %c0_15] : memref<2x168x96xf32, #tpu.memory_space<vmem>>, vector<1x8x96xf32>
    %15 = vector.shape_cast %14 : vector<1x8x96xf32> to vector<8x96xf32>
    %16 = vector.extract_strided_slice %15 {offsets = [0, 0], sizes = [1, 96], strides = [1, 1]} : vector<8x96xf32> to vector<1x96xf32>
    %17 = vector.extract_strided_slice %15 {offsets = [1, 0], sizes = [1, 32], strides = [1, 1]} : vector<8x96xf32> to vector<1x32xf32>
    %18 = vector.extract_strided_slice %15 {offsets = [2, 0], sizes = [1, 32], strides = [1, 1]} : vector<8x96xf32> to vector<1x32xf32>
    %19 = vector.extract_strided_slice %15 {offsets = [3, 0], sizes = [1, 32], strides = [1, 1]} : vector<8x96xf32> to vector<1x32xf32>
    %20 = vector.extract_strided_slice %15 {offsets = [4, 0], sizes = [1, 64], strides = [1, 1]} : vector<8x96xf32> to vector<1x64xf32>
    %21 = vector.extract_strided_slice %15 {offsets = [5, 0], sizes = [1, 32], strides = [1, 1]} : vector<8x96xf32> to vector<1x32xf32>
    %22 = vector.extract_strided_slice %15 {offsets = [6, 0], sizes = [1, 32], strides = [1, 1]} : vector<8x96xf32> to vector<1x32xf32>
    %23 = vector.extract_strided_slice %15 {offsets = [7, 0], sizes = [1, 32], strides = [1, 1]} : vector<8x96xf32> to vector<1x32xf32>
    %cst_16 = arith.constant dense<0.000000e+00> : vector<16x96xf32>
    %24 = tpu.matmul %5, %7, %cst_16 {dimension_numbers = #tpu.dot_dimension_numbers<[1], [0], [0], [1], [0, 0, 1, 1], [], []>} : vector<16x32xf32>, vector<32x96xf32>, vector<16x96xf32> -> vector<16x96xf32>
    %25 = vector.broadcast %16 : vector<1x96xf32> to vector<16x96xf32>
    %26 = arith.addf %24, %25 : vector<16x96xf32>
    %27 = vector.extract_strided_slice %26 {offsets = [0, 0], sizes = [16, 8], strides = [1, 1]} : vector<16x96xf32> to vector<16x8xf32>
    %28 = vector.extract_strided_slice %26 {offsets = [0, 8], sizes = [16, 8], strides = [1, 1]} : vector<16x96xf32> to vector<16x8xf32>
    %29 = vector.extract_strided_slice %26 {offsets = [0, 16], sizes = [16, 8], strides = [1, 1]} : vector<16x96xf32> to vector<16x8xf32>
    %30 = vector.extract_strided_slice %26 {offsets = [0, 24], sizes = [16, 8], strides = [1, 1]} : vector<16x96xf32> to vector<16x8xf32>
    %31 = tpu.concatenate %27, %28, %29, %30 in 0 : vector<16x8xf32>, vector<16x8xf32>, vector<16x8xf32>, vector<16x8xf32> -> vector<64x8xf32>
    %32 = vector.extract_strided_slice %26 {offsets = [0, 32], sizes = [16, 8], strides = [1, 1]} : vector<16x96xf32> to vector<16x8xf32>
    %33 = vector.extract_strided_slice %26 {offsets = [0, 40], sizes = [16, 8], strides = [1, 1]} : vector<16x96xf32> to vector<16x8xf32>
    %34 = vector.extract_strided_slice %26 {offsets = [0, 48], sizes = [16, 8], strides = [1, 1]} : vector<16x96xf32> to vector<16x8xf32>
    %35 = vector.extract_strided_slice %26 {offsets = [0, 56], sizes = [16, 8], strides = [1, 1]} : vector<16x96xf32> to vector<16x8xf32>
    %36 = tpu.concatenate %32, %33, %34, %35 in 0 : vector<16x8xf32>, vector<16x8xf32>, vector<16x8xf32>, vector<16x8xf32> -> vector<64x8xf32>
    %37 = vector.extract_strided_slice %26 {offsets = [0, 64], sizes = [16, 8], strides = [1, 1]} : vector<16x96xf32> to vector<16x8xf32>
    %38 = vector.extract_strided_slice %26 {offsets = [0, 72], sizes = [16, 8], strides = [1, 1]} : vector<16x96xf32> to vector<16x8xf32>
    %39 = vector.extract_strided_slice %26 {offsets = [0, 80], sizes = [16, 8], strides = [1, 1]} : vector<16x96xf32> to vector<16x8xf32>
    %40 = vector.extract_strided_slice %26 {offsets = [0, 88], sizes = [16, 8], strides = [1, 1]} : vector<16x96xf32> to vector<16x8xf32>
    %41 = tpu.concatenate %37, %38, %39, %40 in 0 : vector<16x8xf32>, vector<16x8xf32>, vector<16x8xf32>, vector<16x8xf32> -> vector<64x8xf32>
    %cst_17 = arith.constant dense<0.000000e+00> : vector<64x64xf32>
    %42 = tpu.matmul %31, %36, %cst_17 {dimension_numbers = #tpu.dot_dimension_numbers<[1], [1], [0], [0], [0, 0, 1, 0], [], []>} : vector<64x8xf32>, vector<64x8xf32>, vector<64x64xf32> -> vector<64x64xf32>
    %43 = arith.addf %42, %0 : vector<64x64xf32>
    %cst_18 = arith.constant dense<0xFF800000> : vector<64xf32>
    %44 = vector.multi_reduction <maximumf>, %43, %cst_18 [1] : vector<64x64xf32> to vector<64xf32>
    %45 = vector.shape_cast %44 : vector<64xf32> to vector<64x1xf32>
    %46 = vector.broadcast %45 : vector<64x1xf32> to vector<64x64xf32>
    %47 = arith.subf %43, %46 : vector<64x64xf32>
    %48 = math.exp %47 : vector<64x64xf32>
    %cst_19 = arith.constant dense<0.000000e+00> : vector<64xf32>
    %49 = vector.multi_reduction <add>, %48, %cst_19 [1] : vector<64x64xf32> to vector<64xf32>
    %50 = vector.shape_cast %49 : vector<64xf32> to vector<64x1xf32>
    %51 = tpu.reciprocal %50 {approx = true} : vector<64x1xf32> -> vector<64x1xf32>
    %52 = vector.broadcast %51 : vector<64x1xf32> to vector<64x64xf32>
    %53 = arith.mulf %48, %52 : vector<64x64xf32>
    %cst_20 = arith.constant dense<0.000000e+00> : vector<64x8xf32>
    %54 = tpu.matmul %53, %41, %cst_20 {dimension_numbers = #tpu.dot_dimension_numbers<[1], [0], [0], [1], [0, 0, 1, 1], [], []>} : vector<64x64xf32>, vector<64x8xf32>, vector<64x8xf32> -> vector<64x8xf32>
    %55 = vector.extract_strided_slice %54 {offsets = [0, 0], sizes = [16, 8], strides = [1, 1]} : vector<64x8xf32> to vector<16x8xf32>
    %56 = vector.extract_strided_slice %54 {offsets = [16, 0], sizes = [16, 8], strides = [1, 1]} : vector<64x8xf32> to vector<16x8xf32>
    %57 = vector.extract_strided_slice %54 {offsets = [32, 0], sizes = [16, 8], strides = [1, 1]} : vector<64x8xf32> to vector<16x8xf32>
    %58 = vector.extract_strided_slice %54 {offsets = [48, 0], sizes = [16, 8], strides = [1, 1]} : vector<64x8xf32> to vector<16x8xf32>
    %59 = tpu.concatenate %55, %56, %57, %58 in 1 : vector<16x8xf32>, vector<16x8xf32>, vector<16x8xf32>, vector<16x8xf32> -> vector<16x32xf32>
    %cst_21 = arith.constant dense<0.000000e+00> : vector<16x32xf32>
    %60 = tpu.matmul %59, %9, %cst_21 {dimension_numbers = #tpu.dot_dimension_numbers<[1], [0], [0], [1], [0, 0, 1, 1], [], []>} : vector<16x32xf32>, vector<32x32xf32>, vector<16x32xf32> -> vector<16x32xf32>
    %61 = vector.broadcast %17 : vector<1x32xf32> to vector<16x32xf32>
    %62 = arith.addf %60, %61 : vector<16x32xf32>
    %63 = arith.addf %5, %62 : vector<16x32xf32>
    %cst_22 = arith.constant dense<0.000000e+00> : vector<16xf32>
    %64 = vector.multi_reduction <add>, %63, %cst_22 [1] : vector<16x32xf32> to vector<16xf32>
    %65 = vector.shape_cast %64 : vector<16xf32> to vector<16x1xf32>
    %cst_23 = arith.constant 3.200000e+01 : f32
    %66 = vector.broadcast %cst_23 : f32 to vector<16x1xf32>
    %67 = arith.divf %65, %66 : vector<16x1xf32>
    %68 = vector.broadcast %67 : vector<16x1xf32> to vector<16x32xf32>
    %69 = arith.subf %63, %68 : vector<16x32xf32>
    %70 = arith.mulf %69, %69 : vector<16x32xf32>
    %cst_24 = arith.constant dense<0.000000e+00> : vector<16xf32>
    %71 = vector.multi_reduction <add>, %70, %cst_24 [1] : vector<16x32xf32> to vector<16xf32>
    %72 = vector.shape_cast %71 : vector<16xf32> to vector<16x1xf32>
    %cst_25 = arith.constant 3.200000e+01 : f32
    %73 = vector.broadcast %cst_25 : f32 to vector<16x1xf32>
    %74 = arith.divf %72, %73 : vector<16x1xf32>
    %75 = vector.broadcast %67 : vector<16x1xf32> to vector<16x32xf32>
    %76 = arith.subf %63, %75 : vector<16x32xf32>
    %cst_26 = arith.constant 9.99999974E-6 : f32
    %77 = vector.broadcast %cst_26 : f32 to vector<16x1xf32>
    %78 = arith.addf %74, %77 : vector<16x1xf32>
    %79 = math.rsqrt %78 : vector<16x1xf32>
    %80 = vector.broadcast %79 : vector<16x1xf32> to vector<16x32xf32>
    %81 = arith.mulf %76, %80 : vector<16x32xf32>
    %82 = vector.broadcast %18 : vector<1x32xf32> to vector<16x32xf32>
    %83 = arith.mulf %81, %82 : vector<16x32xf32>
    %84 = vector.broadcast %19 : vector<1x32xf32> to vector<16x32xf32>
    %85 = arith.addf %83, %84 : vector<16x32xf32>
    %cst_27 = arith.constant dense<0.000000e+00> : vector<16x64xf32>
    %86 = tpu.matmul %85, %11, %cst_27 {dimension_numbers = #tpu.dot_dimension_numbers<[1], [0], [0], [1], [0, 0, 1, 1], [], []>} : vector<16x32xf32>, vector<32x64xf32>, vector<16x64xf32> -> vector<16x64xf32>
    %87 = vector.broadcast %20 : vector<1x64xf32> to vector<16x64xf32>
    %88 = arith.addf %86, %87 : vector<16x64xf32>
    %cst_28 = arith.constant 0.000000e+00 : f32
    %89 = vector.broadcast %cst_28 : f32 to vector<16x64xf32>
    %90 = arith.maximumf %88, %89 : vector<16x64xf32>
    %cst_29 = arith.constant dense<0.000000e+00> : vector<16x32xf32>
    %91 = tpu.matmul %90, %13, %cst_29 {dimension_numbers = #tpu.dot_dimension_numbers<[1], [0], [0], [1], [0, 0, 1, 1], [], []>} : vector<16x64xf32>, vector<64x32xf32>, vector<16x32xf32> -> vector<16x32xf32>
    %92 = vector.broadcast %21 : vector<1x32xf32> to vector<16x32xf32>
    %93 = arith.addf %91, %92 : vector<16x32xf32>
    %94 = arith.addf %85, %93 : vector<16x32xf32>
    %cst_30 = arith.constant dense<0.000000e+00> : vector<16xf32>
    %95 = vector.multi_reduction <add>, %94, %cst_30 [1] : vector<16x32xf32> to vector<16xf32>
    %96 = vector.shape_cast %95 : vector<16xf32> to vector<16x1xf32>
    %cst_31 = arith.constant 3.200000e+01 : f32
    %97 = vector.broadcast %cst_31 : f32 to vector<16x1xf32>
    %98 = arith.divf %96, %97 : vector<16x1xf32>
    %99 = vector.broadcast %98 : vector<16x1xf32> to vector<16x32xf32>
    %100 = arith.subf %94, %99 : vector<16x32xf32>
    %101 = arith.mulf %100, %100 : vector<16x32xf32>
    %cst_32 = arith.constant dense<0.000000e+00> : vector<16xf32>
    %102 = vector.multi_reduction <add>, %101, %cst_32 [1] : vector<16x32xf32> to vector<16xf32>
    %103 = vector.shape_cast %102 : vector<16xf32> to vector<16x1xf32>
    %cst_33 = arith.constant 3.200000e+01 : f32
    %104 = vector.broadcast %cst_33 : f32 to vector<16x1xf32>
    %105 = arith.divf %103, %104 : vector<16x1xf32>
    %106 = vector.broadcast %98 : vector<16x1xf32> to vector<16x32xf32>
    %107 = arith.subf %94, %106 : vector<16x32xf32>
    %cst_34 = arith.constant 9.99999974E-6 : f32
    %108 = vector.broadcast %cst_34 : f32 to vector<16x1xf32>
    %109 = arith.addf %105, %108 : vector<16x1xf32>
    %110 = math.rsqrt %109 : vector<16x1xf32>
    %111 = vector.broadcast %110 : vector<16x1xf32> to vector<16x32xf32>
    %112 = arith.mulf %107, %111 : vector<16x32xf32>
    %113 = vector.broadcast %22 : vector<1x32xf32> to vector<16x32xf32>
    %114 = arith.mulf %112, %113 : vector<16x32xf32>
    %115 = vector.broadcast %23 : vector<1x32xf32> to vector<16x32xf32>
    %116 = arith.addf %114, %115 : vector<16x32xf32>
    %c1 = arith.constant 1 : index
    %c0_35 = arith.constant 0 : index
    %c0_36 = arith.constant 0 : index
    %117 = vector.load %arg2[%c1, %c0_35, %c0_36] : memref<2x168x96xf32, #tpu.memory_space<vmem>>, vector<1x32x96xf32>
    %118 = vector.shape_cast %117 : vector<1x32x96xf32> to vector<32x96xf32>
    %c1_37 = arith.constant 1 : index
    %c32_38 = arith.constant 32 : index
    %c0_39 = arith.constant 0 : index
    %119 = vector.load %arg2[%c1_37, %c32_38, %c0_39] : memref<2x168x96xf32, #tpu.memory_space<vmem>>, vector<1x32x32xf32>
    %120 = vector.shape_cast %119 : vector<1x32x32xf32> to vector<32x32xf32>
    %c1_40 = arith.constant 1 : index
    %c64_41 = arith.constant 64 : index
    %c0_42 = arith.constant 0 : index
    %121 = vector.load %arg2[%c1_40, %c64_41, %c0_42] : memref<2x168x96xf32, #tpu.memory_space<vmem>>, vector<1x32x64xf32>
    %122 = vector.shape_cast %121 : vector<1x32x64xf32> to vector<32x64xf32>
    %c1_43 = arith.constant 1 : index
    %c96_44 = arith.constant 96 : index
    %c0_45 = arith.constant 0 : index
    %123 = vector.load %arg2[%c1_43, %c96_44, %c0_45] : memref<2x168x96xf32, #tpu.memory_space<vmem>>, vector<1x64x32xf32>
    %124 = vector.shape_cast %123 : vector<1x64x32xf32> to vector<64x32xf32>
    %c1_46 = arith.constant 1 : index
    %c160_47 = arith.constant 160 : index
    %c0_48 = arith.constant 0 : index
    %125 = vector.load %arg2[%c1_46, %c160_47, %c0_48] : memref<2x168x96xf32, #tpu.memory_space<vmem>>, vector<1x8x96xf32>
    %126 = vector.shape_cast %125 : vector<1x8x96xf32> to vector<8x96xf32>
    %127 = vector.extract_strided_slice %126 {offsets = [0, 0], sizes = [1, 96], strides = [1, 1]} : vector<8x96xf32> to vector<1x96xf32>
    %128 = vector.extract_strided_slice %126 {offsets = [1, 0], sizes = [1, 32], strides = [1, 1]} : vector<8x96xf32> to vector<1x32xf32>
    %129 = vector.extract_strided_slice %126 {offsets = [2, 0], sizes = [1, 32], strides = [1, 1]} : vector<8x96xf32> to vector<1x32xf32>
    %130 = vector.extract_strided_slice %126 {offsets = [3, 0], sizes = [1, 32], strides = [1, 1]} : vector<8x96xf32> to vector<1x32xf32>
    %131 = vector.extract_strided_slice %126 {offsets = [4, 0], sizes = [1, 64], strides = [1, 1]} : vector<8x96xf32> to vector<1x64xf32>
    %132 = vector.extract_strided_slice %126 {offsets = [5, 0], sizes = [1, 32], strides = [1, 1]} : vector<8x96xf32> to vector<1x32xf32>
    %133 = vector.extract_strided_slice %126 {offsets = [6, 0], sizes = [1, 32], strides = [1, 1]} : vector<8x96xf32> to vector<1x32xf32>
    %134 = vector.extract_strided_slice %126 {offsets = [7, 0], sizes = [1, 32], strides = [1, 1]} : vector<8x96xf32> to vector<1x32xf32>
    %cst_49 = arith.constant dense<0.000000e+00> : vector<16x96xf32>
    %135 = tpu.matmul %116, %118, %cst_49 {dimension_numbers = #tpu.dot_dimension_numbers<[1], [0], [0], [1], [0, 0, 1, 1], [], []>} : vector<16x32xf32>, vector<32x96xf32>, vector<16x96xf32> -> vector<16x96xf32>
    %136 = vector.broadcast %127 : vector<1x96xf32> to vector<16x96xf32>
    %137 = arith.addf %135, %136 : vector<16x96xf32>
    %138 = vector.extract_strided_slice %137 {offsets = [0, 0], sizes = [16, 8], strides = [1, 1]} : vector<16x96xf32> to vector<16x8xf32>
    %139 = vector.extract_strided_slice %137 {offsets = [0, 8], sizes = [16, 8], strides = [1, 1]} : vector<16x96xf32> to vector<16x8xf32>
    %140 = vector.extract_strided_slice %137 {offsets = [0, 16], sizes = [16, 8], strides = [1, 1]} : vector<16x96xf32> to vector<16x8xf32>
    %141 = vector.extract_strided_slice %137 {offsets = [0, 24], sizes = [16, 8], strides = [1, 1]} : vector<16x96xf32> to vector<16x8xf32>
    %142 = tpu.concatenate %138, %139, %140, %141 in 0 : vector<16x8xf32>, vector<16x8xf32>, vector<16x8xf32>, vector<16x8xf32> -> vector<64x8xf32>
    %143 = vector.extract_strided_slice %137 {offsets = [0, 32], sizes = [16, 8], strides = [1, 1]} : vector<16x96xf32> to vector<16x8xf32>
    %144 = vector.extract_strided_slice %137 {offsets = [0, 40], sizes = [16, 8], strides = [1, 1]} : vector<16x96xf32> to vector<16x8xf32>
    %145 = vector.extract_strided_slice %137 {offsets = [0, 48], sizes = [16, 8], strides = [1, 1]} : vector<16x96xf32> to vector<16x8xf32>
    %146 = vector.extract_strided_slice %137 {offsets = [0, 56], sizes = [16, 8], strides = [1, 1]} : vector<16x96xf32> to vector<16x8xf32>
    %147 = tpu.concatenate %143, %144, %145, %146 in 0 : vector<16x8xf32>, vector<16x8xf32>, vector<16x8xf32>, vector<16x8xf32> -> vector<64x8xf32>
    %148 = vector.extract_strided_slice %137 {offsets = [0, 64], sizes = [16, 8], strides = [1, 1]} : vector<16x96xf32> to vector<16x8xf32>
    %149 = vector.extract_strided_slice %137 {offsets = [0, 72], sizes = [16, 8], strides = [1, 1]} : vector<16x96xf32> to vector<16x8xf32>
    %150 = vector.extract_strided_slice %137 {offsets = [0, 80], sizes = [16, 8], strides = [1, 1]} : vector<16x96xf32> to vector<16x8xf32>
    %151 = vector.extract_strided_slice %137 {offsets = [0, 88], sizes = [16, 8], strides = [1, 1]} : vector<16x96xf32> to vector<16x8xf32>
    %152 = tpu.concatenate %148, %149, %150, %151 in 0 : vector<16x8xf32>, vector<16x8xf32>, vector<16x8xf32>, vector<16x8xf32> -> vector<64x8xf32>
    %cst_50 = arith.constant dense<0.000000e+00> : vector<64x64xf32>
    %153 = tpu.matmul %142, %147, %cst_50 {dimension_numbers = #tpu.dot_dimension_numbers<[1], [1], [0], [0], [0, 0, 1, 0], [], []>} : vector<64x8xf32>, vector<64x8xf32>, vector<64x64xf32> -> vector<64x64xf32>
    %154 = arith.addf %153, %0 : vector<64x64xf32>
    %cst_51 = arith.constant dense<0xFF800000> : vector<64xf32>
    %155 = vector.multi_reduction <maximumf>, %154, %cst_51 [1] : vector<64x64xf32> to vector<64xf32>
    %156 = vector.shape_cast %155 : vector<64xf32> to vector<64x1xf32>
    %157 = vector.broadcast %156 : vector<64x1xf32> to vector<64x64xf32>
    %158 = arith.subf %154, %157 : vector<64x64xf32>
    %159 = math.exp %158 : vector<64x64xf32>
    %cst_52 = arith.constant dense<0.000000e+00> : vector<64xf32>
    %160 = vector.multi_reduction <add>, %159, %cst_52 [1] : vector<64x64xf32> to vector<64xf32>
    %161 = vector.shape_cast %160 : vector<64xf32> to vector<64x1xf32>
    %162 = tpu.reciprocal %161 {approx = true} : vector<64x1xf32> -> vector<64x1xf32>
    %163 = vector.broadcast %162 : vector<64x1xf32> to vector<64x64xf32>
    %164 = arith.mulf %159, %163 : vector<64x64xf32>
    %cst_53 = arith.constant dense<0.000000e+00> : vector<64x8xf32>
    %165 = tpu.matmul %164, %152, %cst_53 {dimension_numbers = #tpu.dot_dimension_numbers<[1], [0], [0], [1], [0, 0, 1, 1], [], []>} : vector<64x64xf32>, vector<64x8xf32>, vector<64x8xf32> -> vector<64x8xf32>
    %166 = vector.extract_strided_slice %165 {offsets = [0, 0], sizes = [16, 8], strides = [1, 1]} : vector<64x8xf32> to vector<16x8xf32>
    %167 = vector.extract_strided_slice %165 {offsets = [16, 0], sizes = [16, 8], strides = [1, 1]} : vector<64x8xf32> to vector<16x8xf32>
    %168 = vector.extract_strided_slice %165 {offsets = [32, 0], sizes = [16, 8], strides = [1, 1]} : vector<64x8xf32> to vector<16x8xf32>
    %169 = vector.extract_strided_slice %165 {offsets = [48, 0], sizes = [16, 8], strides = [1, 1]} : vector<64x8xf32> to vector<16x8xf32>
    %170 = tpu.concatenate %166, %167, %168, %169 in 1 : vector<16x8xf32>, vector<16x8xf32>, vector<16x8xf32>, vector<16x8xf32> -> vector<16x32xf32>
    %cst_54 = arith.constant dense<0.000000e+00> : vector<16x32xf32>
    %171 = tpu.matmul %170, %120, %cst_54 {dimension_numbers = #tpu.dot_dimension_numbers<[1], [0], [0], [1], [0, 0, 1, 1], [], []>} : vector<16x32xf32>, vector<32x32xf32>, vector<16x32xf32> -> vector<16x32xf32>
    %172 = vector.broadcast %128 : vector<1x32xf32> to vector<16x32xf32>
    %173 = arith.addf %171, %172 : vector<16x32xf32>
    %174 = arith.addf %116, %173 : vector<16x32xf32>
    %cst_55 = arith.constant dense<0.000000e+00> : vector<16xf32>
    %175 = vector.multi_reduction <add>, %174, %cst_55 [1] : vector<16x32xf32> to vector<16xf32>
    %176 = vector.shape_cast %175 : vector<16xf32> to vector<16x1xf32>
    %cst_56 = arith.constant 3.200000e+01 : f32
    %177 = vector.broadcast %cst_56 : f32 to vector<16x1xf32>
    %178 = arith.divf %176, %177 : vector<16x1xf32>
    %179 = vector.broadcast %178 : vector<16x1xf32> to vector<16x32xf32>
    %180 = arith.subf %174, %179 : vector<16x32xf32>
    %181 = arith.mulf %180, %180 : vector<16x32xf32>
    %cst_57 = arith.constant dense<0.000000e+00> : vector<16xf32>
    %182 = vector.multi_reduction <add>, %181, %cst_57 [1] : vector<16x32xf32> to vector<16xf32>
    %183 = vector.shape_cast %182 : vector<16xf32> to vector<16x1xf32>
    %cst_58 = arith.constant 3.200000e+01 : f32
    %184 = vector.broadcast %cst_58 : f32 to vector<16x1xf32>
    %185 = arith.divf %183, %184 : vector<16x1xf32>
    %186 = vector.broadcast %178 : vector<16x1xf32> to vector<16x32xf32>
    %187 = arith.subf %174, %186 : vector<16x32xf32>
    %cst_59 = arith.constant 9.99999974E-6 : f32
    %188 = vector.broadcast %cst_59 : f32 to vector<16x1xf32>
    %189 = arith.addf %185, %188 : vector<16x1xf32>
    %190 = math.rsqrt %189 : vector<16x1xf32>
    %191 = vector.broadcast %190 : vector<16x1xf32> to vector<16x32xf32>
    %192 = arith.mulf %187, %191 : vector<16x32xf32>
    %193 = vector.broadcast %129 : vector<1x32xf32> to vector<16x32xf32>
    %194 = arith.mulf %192, %193 : vector<16x32xf32>
    %195 = vector.broadcast %130 : vector<1x32xf32> to vector<16x32xf32>
    %196 = arith.addf %194, %195 : vector<16x32xf32>
    %cst_60 = arith.constant dense<0.000000e+00> : vector<16x64xf32>
    %197 = tpu.matmul %196, %122, %cst_60 {dimension_numbers = #tpu.dot_dimension_numbers<[1], [0], [0], [1], [0, 0, 1, 1], [], []>} : vector<16x32xf32>, vector<32x64xf32>, vector<16x64xf32> -> vector<16x64xf32>
    %198 = vector.broadcast %131 : vector<1x64xf32> to vector<16x64xf32>
    %199 = arith.addf %197, %198 : vector<16x64xf32>
    %cst_61 = arith.constant 0.000000e+00 : f32
    %200 = vector.broadcast %cst_61 : f32 to vector<16x64xf32>
    %201 = arith.maximumf %199, %200 : vector<16x64xf32>
    %cst_62 = arith.constant dense<0.000000e+00> : vector<16x32xf32>
    %202 = tpu.matmul %201, %124, %cst_62 {dimension_numbers = #tpu.dot_dimension_numbers<[1], [0], [0], [1], [0, 0, 1, 1], [], []>} : vector<16x64xf32>, vector<64x32xf32>, vector<16x32xf32> -> vector<16x32xf32>
    %203 = vector.broadcast %132 : vector<1x32xf32> to vector<16x32xf32>
    %204 = arith.addf %202, %203 : vector<16x32xf32>
    %205 = arith.addf %196, %204 : vector<16x32xf32>
    %cst_63 = arith.constant dense<0.000000e+00> : vector<16xf32>
    %206 = vector.multi_reduction <add>, %205, %cst_63 [1] : vector<16x32xf32> to vector<16xf32>
    %207 = vector.shape_cast %206 : vector<16xf32> to vector<16x1xf32>
    %cst_64 = arith.constant 3.200000e+01 : f32
    %208 = vector.broadcast %cst_64 : f32 to vector<16x1xf32>
    %209 = arith.divf %207, %208 : vector<16x1xf32>
    %210 = vector.broadcast %209 : vector<16x1xf32> to vector<16x32xf32>
    %211 = arith.subf %205, %210 : vector<16x32xf32>
    %212 = arith.mulf %211, %211 : vector<16x32xf32>
    %cst_65 = arith.constant dense<0.000000e+00> : vector<16xf32>
    %213 = vector.multi_reduction <add>, %212, %cst_65 [1] : vector<16x32xf32> to vector<16xf32>
    %214 = vector.shape_cast %213 : vector<16xf32> to vector<16x1xf32>
    %cst_66 = arith.constant 3.200000e+01 : f32
    %215 = vector.broadcast %cst_66 : f32 to vector<16x1xf32>
    %216 = arith.divf %214, %215 : vector<16x1xf32>
    %217 = vector.broadcast %209 : vector<16x1xf32> to vector<16x32xf32>
    %218 = arith.subf %205, %217 : vector<16x32xf32>
    %cst_67 = arith.constant 9.99999974E-6 : f32
    %219 = vector.broadcast %cst_67 : f32 to vector<16x1xf32>
    %220 = arith.addf %216, %219 : vector<16x1xf32>
    %221 = math.rsqrt %220 : vector<16x1xf32>
    %222 = vector.broadcast %221 : vector<16x1xf32> to vector<16x32xf32>
    %223 = arith.mulf %218, %222 : vector<16x32xf32>
    %224 = vector.broadcast %133 : vector<1x32xf32> to vector<16x32xf32>
    %225 = arith.mulf %223, %224 : vector<16x32xf32>
    %226 = vector.broadcast %134 : vector<1x32xf32> to vector<16x32xf32>
    %227 = arith.addf %225, %226 : vector<16x32xf32>
    %228 = vector.extract_strided_slice %227 {offsets = [7, 0], sizes = [1, 32], strides = [1, 1]} : vector<16x32xf32> to vector<1x32xf32>
    %229 = vector.extract_strided_slice %227 {offsets = [15, 0], sizes = [1, 32], strides = [1, 1]} : vector<16x32xf32> to vector<1x32xf32>
    %230 = tpu.concatenate %228, %229 in 0 : vector<1x32xf32>, vector<1x32xf32> -> vector<2x32xf32>
    %c0_68 = arith.constant 0 : index
    %c0_69 = arith.constant 0 : index
    %231 = vector.load %arg3[%c0_68, %c0_69] : memref<40x128xf32, #tpu.memory_space<vmem>>, vector<32x128xf32>
    %c32_70 = arith.constant 32 : index
    %c0_71 = arith.constant 0 : index
    %232 = vector.load %arg3[%c32_70, %c0_71] : memref<40x128xf32, #tpu.memory_space<vmem>>, vector<1x128xf32>
    %cst_72 = arith.constant dense<0.000000e+00> : vector<2x128xf32>
    %233 = tpu.matmul %230, %231, %cst_72 {dimension_numbers = #tpu.dot_dimension_numbers<[1], [0], [0], [1], [0, 0, 1, 1], [], []>} : vector<2x32xf32>, vector<32x128xf32>, vector<2x128xf32> -> vector<2x128xf32>
    %234 = vector.broadcast %232 : vector<1x128xf32> to vector<2x128xf32>
    %235 = arith.addf %233, %234 : vector<2x128xf32>
    %c0_73 = arith.constant 0 : index
    %c0_74 = arith.constant 0 : index
    %236 = vector.load %arg4[%c0_73, %c0_74] : memref<2x128xf32, #tpu.memory_space<vmem>>, vector<2x128xf32>
    tpu.vector_store %arg4[%c0_73, %c0_74], %235 {strides = array<i32>} : memref<2x128xf32, #tpu.memory_space<vmem>>, vector<2x128xf32>,
    return
  }
}

</mosaic_0001>

<bundles_post_ra>
// kernel: transformer_forward.1
= control target key start
LH: loop header
LB: loop body
LE: loop exit
PB: predicated region body
PF: predicated region fallthrough
CT: control target
= control target key end

     0   :  { %9 = vsyncpa [#allocation3], 0  ;;  %s1444_s18 = smov [#allocation2]   ;;  %s1445_s20 = smov 128   ;;  %s1938_s0 = inlined_call_operand.vmem [shape: f32[16,32], index: 0, kind: input, shape index: {}]   ;;  %s1939_s1 = inlined_call_operand.vmem [shape: f32[80,64], index: 1, kind: input, shape index: {}]   ;;  %s1940_s2 = inlined_call_operand.hbm [shape: f32[2,168,96], index: 2, kind: input, shape index: {}]   ;;  %s1941_s3 = inlined_call_operand.vmem [shape: f32[40,128], index: 3, kind: input, shape index: {}]   ;;  %s1942_s4 = inlined_call_operand.vmem [shape: f32[2,128], index: 4, kind: output, shape index: {}]  }
   0x1   :  { %s18_s17 = sshll.u32 %s1940_s2, 4  ;;  %s20_s19 = sshll.u32 %s1444_s18, 4  ;;  %s19_s17 = int_to_ptr.hbm [resolvable:$true] %s18_s17  ;;  %s21_s19 = int_to_ptr.vmem [resolvable:$true] %s20_s19 }
   0x2   :  { %s1446_s21 = smov 8  }
   0x3   :  { %26 = dma.hbm_to_vmem [thread:$0]  %s19_s17, 5376, %s21_s19, [#allocation3], %s1445_s20, %s1445_s20, %s1446_s21  }
   0x4   :  { %1442 = dma.done.wait [#allocation3], 5376  }
   0x5   :  { %1443 = vsyncadd [#allocation3], 4294961920  ;;  %v52_v0 = vld [vmem:[#allocation2 + $0x18] sm:$0xff]  ;;  %v51_v1 = vld [vmem:[#allocation2 + $0x10] sm:$0xff]  ;;  %vm71_vm0 = vcmask 261120   ;;  %s1448_s29 = smov 112  }
   0x6   :  { %90 = vmatpush.msra.mxu0 %v52_v0  ;;  %v41_v2 = vld [vmem:[%s1939_s1 + $0x40] sm:$0xff]  ;;  %v50_v4 = vld [vmem:[#allocation2 + $0x8] sm:$0xff]  ;;  %s1449_s30 = smov 104   ;;  %s1450_s5 = smov 96   ;;  %vm131_vm1 = vcmask 64512   ;;  %vm205_vm2 = vcmask 523264  }
   0x7   :  { %v43_v3 = vld [vmem:[%s1938_s0] sm:$0xff]  ;;  %v44_v8 = vld [vmem:[%s1938_s0 + $0x8] sm:$0xff]  ;;  %s1447_s0 = smov 120   ;;  %v1588_v40 = vld [vmem:[%s1939_s1 + $0x10] sm:$0xff]  ;;  %s1451_s16 = smov 64   ;;  %vm409_vm3 = vcmask 130048  }
   0x8   :  { %v45_v5 = vmul.f32 5.656854, %v43_v3  ;;  %91 = vmatpush.msra.mxu0 %v51_v1  ;;  %v49_v6 = vld [vmem:[#allocation2] sm:$0xff]  ;;  %v46_v9 = vmul.f32 5.656854, %v44_v8  ;;  %v42_v10 = vld [vmem:[%s1939_s1 + $0x48] sm:$0xff] }
   0x9   :  { %v1504_v13 = vld [vmem:[#allocation2 + $0xa0] sm:$0xff]  ;;  %v1581_v36 = vld [vmem:[%s1939_s1 + $0x8] sm:$0xff]  ;;  %v1598_v44 = vld [vmem:[%s1939_s1 + $0x18] sm:$0xff]  ;;  %s1453_s24 = smov 24   ;;  %vm412_vm4 = vcmask 195584  }
   0xa   :  { %v1490_v7 = vadd.f32 %v45_v5, %v41_v2  ;;  %92 = vmatpush.msra.mxu0 %v50_v4  ;;  %v1500_v11 = vadd.f32 %v46_v9, %v42_v10  ;;  %v70_v14 = vperm.slane %v1504_v13, 0  ;;  %v1574_v32 = vld [vmem:[%s1939_s1] sm:$0xff]  ;;  %v1617_v55 = vld [vmem:[%s1939_s1 + $0x30] sm:$0xff]  ;;  %v1624_v59 = vld [vmem:[%s1939_s1 + $0x28] sm:$0xff] }
   0xb   :  { %v1606_v49 = vld [vmem:[%s1939_s1 + $0x20] sm:$0xff]  ;;  %v1634_v62 = vld [vmem:[%s1939_s1 + $0x38] sm:$0xff]  ;;  %s1452_s1 = smov 16  }
   0xc   :  { %93 = vmatpush.msra.mxu0 %v49_v6 }
   0xd   :  { %1219 = vmatmul.msk.f32.vlgmr.msra.gmra.mxu0 %vm71_vm0, %v1490_v7 }
  0x15   :  { %1220 = vmatmul.msk.f32.gmra.mxu0 %vm71_vm0, %v1500_v11 }
  0x8a   :  { %v95_v12 = vpop.f32.mrf.mxu0 }
  0x8b   :  { %v1515_v17 = vadd.f32 %v95_v12, %v70_v14 }
  0x92   :  { %v98_v15 = vpop.f32.mrf.mxu0 }
  0x93   :  { %v1507_v16 = vadd.f32 %v98_v15, %v70_v14 }
  0x95   :  { %105 = vrot.lane.b32.xlu2 %v1507_v16, %s1447_s0  ;;  %109 = vrot.lane.b32.xlu1 %v1507_v16, %s1448_s29  ;;  %v1310_v2 = vpack.i.bf16 %v1515_v17, %v1507_v16 }
  0x96   :  { %113 = vrot.lane.b32.xlu0 %v1507_v16, %s1449_s30 }
  0x9d   :  { %103 = vrot.lane.b32.xlu2 %v1515_v17, %s1447_s0  ;;  %107 = vrot.lane.b32.xlu1 %v1515_v17, %s1448_s29 }
  0x9e   :  { %111 = vrot.lane.b32.xlu0 %v1515_v17, %s1449_s30 }
  0xef   :  { %v1523_v18 = vpop.permute.xlu2 %105 }
  0xf7   :  { %v1533_v21 = vpop.permute.xlu2 %103 }
 0x107   :  { %v1525_v19 = vpop.permute.xlu1 %109 }
 0x108   :  { %v1527_v20 = vpop.permute.xlu0 %113  ;;  %125 = vrot.lane.b32.xlu2 %v1525_v19, %s1450_s5 }
 0x109   :  { %129 = vrot.lane.b32.xlu0 %v1527_v20, %s1450_s5 }
 0x10f   :  { %v108_v22 = vpop.permute.xlu1 %107 }
 0x110   :  { %v1535_v23 = vpop.permute.xlu0 %111  ;;  %119 = vrot.lane.b32.xlu2 %v1533_v21, %s1450_s5  ;;  %v1300_v48 = vpack.i.bf16 %v108_v22, %v1525_v19 }
 0x111   :  { %123 = vrot.lane.b32.xlu0 %v108_v22, %s1450_s5  ;;  %127 = vrot.lane.b32.xlu1 %v1535_v23, %s1450_s5  ;;  %v1295_v54 = vpack.i.bf16 %v1535_v23, %v1527_v20 }
 0x119   :  { %117 = vrot.lane.b32.xlu0 %v1507_v16, %s1450_s5  ;;  %121 = vrot.lane.b32.xlu1 %v1523_v18, %s1450_s5 }
 0x121   :  { %115 = vrot.lane.b32.xlu1 %v1515_v17, %s1450_s5 }
 0x162   :  { %v126_v26 = vpop.permute.xlu2 %125 }
 0x16a   :  { %v120_v29 = vpop.permute.xlu2 %119 }
 0x17b   :  { %v130_v24 = vpop.permute.xlu0 %129 }
 0x17c   :  { %1221 = vmatpush.xpose.msk.msra.mxu1 %vm131_vm1, %v130_v24 }
 0x183   :  { %v128_v25 = vpop.permute.xlu1 %127  ;;  %v124_v27 = vpop.permute.xlu0 %123 }
 0x184   :  { %1222 = vmatpush.xpose.msk.msra.mxu1 %vm131_vm1, %v128_v25  ;;  %v1305_v25 = vpack.i.bf16 %v1533_v21, %v1523_v18 }
 0x188   :  { %1223 = vmatpush.xpose.msk.msra.mxu1 %vm131_vm1, %v126_v26 }
 0x18b   :  { %v122_v28 = vpop.permute.xlu1 %121  ;;  %v118_v30 = vpop.permute.xlu0 %117 }
 0x18c   :  { %1224 = vmatpush.xpose.msk.msra.mxu1 %vm131_vm1, %v124_v27 }
 0x190   :  { %1225 = vmatpush.xpose.msk.msra.mxu1 %vm131_vm1, %v122_v28 }
 0x193   :  { %v116_v31 = vpop.permute.xlu1 %115 }
 0x194   :  { %1226 = vmatpush.xpose.msk.msra.mxu1 %vm131_vm1, %v120_v29 }
 0x198   :  { %1227 = vmatpush.xpose.msk.msra.mxu1 %vm131_vm1, %v118_v30 }
 0x19c   :  { %1228 = vmatpush.xpose.msk.msra.mxu1 %vm131_vm1, %v116_v31 }
 0x19f   :  { %1229 = vmatmul.msk.f32.vlgmr.msra.gmra.mxu1 %vm131_vm1, %v1515_v17 }
 0x1a7   :  { %1230 = vmatmul.msk.f32.gmra.mxu1 %vm131_vm1, %v1507_v16 }
 0x1af   :  { %1231 = vmatmul.msk.f32.gmra.mxu1 %vm131_vm1, %v1533_v21 }
 0x1b7   :  { %1232 = vmatmul.msk.f32.gmra.mxu1 %vm131_vm1, %v1523_v18 }
 0x1bf   :  { %1233 = vmatmul.msk.f32.gmra.mxu1 %vm131_vm1, %v108_v22 }
 0x1c7   :  { %1234 = vmatmul.msk.f32.gmra.mxu1 %vm131_vm1, %v1525_v19 }
 0x1cf   :  { %1235 = vmatmul.msk.f32.gmra.mxu1 %vm131_vm1, %v1535_v23 }
 0x1d7   :  { %1236 = vmatmul.msk.f32.gmra.mxu1 %vm131_vm1, %v1527_v20 }
 0x21c   :  { %v181_v33 = vpop.f32.mrf.mxu1 }
 0x21d   :  { %v182_v34 = vadd.f32 %v181_v33, %v1574_v32 }
 0x21f   :  { %v206_v35 = vsel %vm205_vm2, %v182_v34, -inf }
 0x220   :  { %207 = vmax.xlane.f32.xlu2 %v206_v35 }
 0x224   :  { %v184_v37 = vpop.f32.mrf.mxu1 }
 0x225   :  { %v185_v38 = vadd.f32 %v184_v37, %v1581_v36 }
 0x227   :  { %v209_v39 = vsel %vm205_vm2, %v185_v38, -inf }
 0x228   :  { %210 = vmax.xlane.f32.xlu0 %v209_v39 }
 0x22c   :  { %v187_v41 = vpop.f32.mrf.mxu1 }
 0x22d   :  { %v1591_v42 = vadd.f32 %v187_v41, %v1588_v40 }
 0x22f   :  { %v212_v43 = vsel %vm205_vm2, %v1591_v42, -inf }
 0x230   :  { %213 = vmax.xlane.f32.xlu1 %v212_v43 }
 0x234   :  { %v190_v45 = vpop.f32.mrf.mxu1 }
 0x235   :  { %v191_v46 = vadd.f32 %v190_v45, %v1598_v44 }
 0x237   :  { %v215_v47 = vsel %vm205_vm2, %v191_v46, -inf }
 0x238   :  { %216 = vmax.xlane.f32.xlu2 %v215_v47 }
 0x23c   :  { %v193_v50 = vpop.f32.mrf.mxu1  ;;  %1301 = vrot.lane.b32.xlu0 %v1300_v48, %s1451_s16 }
 0x23d   :  { %v194_v51 = vadd.f32 %v193_v50, %v1606_v49 }
 0x23f   :  { %v218_v52 = vsel %vm205_vm2, %v194_v51, -inf }
 0x240   :  { %219 = vmax.xlane.f32.xlu2 %v218_v52 }
 0x244   :  { %v196_v53 = vpop.f32.mrf.mxu1 }
 0x245   :  { %v1627_v60 = vadd.f32 %v196_v53, %v1624_v59 }
 0x247   :  { %v221_v61 = vsel %vm205_vm2, %v1627_v60, -inf }
 0x249   :  { %1296 = vrot.lane.b32.xlu1 %v1295_v54, %s1451_s16 }
 0x24c   :  { %v199_v56 = vpop.f32.mrf.mxu1 }
 0x24d   :  { %v200_v57 = vadd.f32 %v199_v56, %v1617_v55 }
 0x24f   :  { %v224_v58 = vsel %vm205_vm2, %v200_v57, -inf }
 0x250   :  { %225 = vmax.xlane.f32.xlu2 %v224_v58 }
 0x254   :  { %v202_v63 = vpop.f32.mrf.mxu1 }
 0x255   :  { %v1637_v0 = vadd.f32 %v202_v63, %v1634_v62 }
 0x257   :  { %v227_v1 = vsel %vm205_vm2, %v1637_v0, -inf }
 0x266   :  { %222 = vmax.xlane.f32.xlu0 %v221_v61 }
 0x273   :  { %228 = vmax.xlane.f32.xlu1 %v227_v1 }
 0x27a   :  { %1311 = vrot.lane.b32.xlu0 %v1310_v2, %s1451_s16 }
 0x293   :  { %v208_v3 = vpop.xlane.xlu2 %207 }
 0x294   :  { %v230_v4 = vsub.f32 %v182_v34, %v208_v3 }
 0x296   :  { %v238_v5 = vmul.f32 1.442695, %v230_v4 }
 0x298   :  { %1336 = vpow2.f32 %v238_v5 }
 0x29b   :  { %v211_v6 = vpop.xlane.xlu0 %210 }
 0x29c   :  { %v231_v8 = vsub.f32 %v185_v38, %v211_v6 }
 0x29e   :  { %v1644_v9 = vpop.eup %1336  ;;  %v240_v10 = vmul.f32 1.442695, %v231_v8 }
 0x29f   :  { %v254_v12 = vsel %vm205_vm2, %v1644_v9, 0.0 }
 0x2a0   :  { %1338 = vpow2.f32 %v240_v10  ;;  %255 = vadd.xlane.f32.xlu2 %v254_v12 }
 0x2a3   :  { %v214_v20 = vpop.xlane.xlu1 %213 }
 0x2a4   :  { %v232_v41 = vsub.f32 %v1591_v42, %v214_v20 }
 0x2a6   :  { %v1648_v14 = vpop.eup %1338  ;;  %v242_v45 = vmul.f32 1.442695, %v232_v41  ;;  %v56_v41 = vld [vmem:[#allocation2 + $0x38] sm:$0xff] }
 0x2a7   :  { %v257_v15 = vsel %vm205_vm2, %v1648_v14, 0.0  ;;  %434 = vmatpush.msra.mxu3 %v56_v41 }
 0x2a8   :  { %258 = vadd.xlane.f32.xlu0 %v257_v15 }
 0x2ab   :  { %v217_v16 = vpop.xlane.xlu2 %216 }
 0x2ac   :  { %v233_v17 = vsub.f32 %v191_v46, %v217_v16 }
 0x2ae   :  { %v244_v19 = vmul.f32 1.442695, %v233_v17  ;;  %v1302_v30 = vpop.permute.xlu0 %1301 }
 0x2af   :  { %v1303_v18 = vunpack.i.l.bf16 %v1302_v30  ;;  %v1304_v21 = vunpack.i.h.bf16 %v1302_v30 }
 0x2b0   :  { %1340 = vpow2.f32 %v244_v19 }
 0x2b3   :  { %v220_v22 = vpop.xlane.xlu2 %219 }
 0x2b4   :  { %v234_v23 = vsub.f32 %v194_v51, %v220_v22 }
 0x2b6   :  { %v1652_v24 = vpop.eup %1340  ;;  %v246_v26 = vmul.f32 1.442695, %v234_v23 }
 0x2b7   :  { %v263_v27 = vsel %vm205_vm2, %v1652_v24, 0.0 }
 0x2b8   :  { %1342 = vpow2.f32 %v246_v26  ;;  %1306 = vrot.lane.b32.xlu2 %v1305_v25, %s1451_s16  ;;  %264 = vadd.xlane.f32.xlu1 %v263_v27 }
 0x2bb   :  { %v1297_v28 = vpop.permute.xlu1 %1296 }
 0x2bc   :  { %v1298_v29 = vunpack.i.l.bf16 %v1297_v28  ;;  %v1299_v33 = vunpack.i.h.bf16 %v1297_v28 }
 0x2be   :  { %v1659_v31 = vpop.eup %1342  ;;  %350 = vmatpush.msra.mxu2 %v1298_v29 }
 0x2bf   :  { %v266_v34 = vsel %vm205_vm2, %v1659_v31, 0.0 }
 0x2c0   :  { %351 = vmatpush.msra.mxu2 %v1299_v33  ;;  %267 = vadd.xlane.f32.xlu1 %v266_v34 }
 0x2c2   :  { %352 = vmatpush.msra.mxu2 %v1303_v18 }
 0x2c3   :  { %v226_v35 = vpop.xlane.xlu2 %225 }
 0x2c4   :  { %v236_v37 = vsub.f32 %v200_v57, %v226_v35  ;;  %353 = vmatpush.msra.mxu2 %v1304_v21 }
 0x2c6   :  { %v250_v38 = vmul.f32 1.442695, %v236_v37 }
 0x2c8   :  { %1344 = vpow2.f32 %v250_v38 }
 0x2c9   :  { %1346 = vpow2.f32 %v242_v45  ;;  %v54_v45 = vld [vmem:[#allocation2 + $0x28] sm:$0xff] }
 0x2ce   :  { %v1663_v39 = vpop.eup %1344 }
 0x2cf   :  { %v272_v43 = vsel %vm205_vm2, %v1663_v39, 0.0  ;;  %v1347_v50 = vpop.eup %1346 }
 0x2d0   :  { %273 = vadd.xlane.f32.xlu1 %v272_v43  ;;  %v260_v51 = vsel %vm205_vm2, %v1347_v50, 0.0  ;;  %v55_v43 = vld [vmem:[#allocation2 + $0x30] sm:$0xff] }
 0x2d1   :  { %435 = vmatpush.msra.mxu3 %v55_v43 }
 0x2d3   :  { %436 = vmatpush.msra.mxu3 %v54_v45 }
 0x2d9   :  { %v223_v46 = vpop.xlane.xlu0 %222 }
 0x2da   :  { %v235_v47 = vsub.f32 %v1627_v60, %v223_v46  ;;  %v53_v46 = vld [vmem:[#allocation2 + $0x20] sm:$0xff] }
 0x2db   :  { %437 = vmatpush.msra.mxu3 %v53_v46  ;;  %v64_v46 = vld [vmem:[#allocation2 + $0x78] sm:$0xff] }
 0x2dc   :  { %v248_v48 = vmul.f32 1.442695, %v235_v47 }
 0x2de   :  { %1348 = vpow2.f32 %v248_v48 }
 0x2e1   :  { %261 = vadd.xlane.f32.xlu2 %v260_v51 }
 0x2e4   :  { %v1349_v52 = vpop.eup %1348 }
 0x2e5   :  { %v269_v53 = vsel %vm205_vm2, %v1349_v52, 0.0 }
 0x2e6   :  { %v229_v54 = vpop.xlane.xlu1 %228  ;;  %270 = vadd.xlane.f32.xlu0 %v269_v53 }
 0x2e7   :  { %v237_v42 = vsub.f32 %v1637_v0, %v229_v54 }
 0x2e9   :  { %v252_v56 = vmul.f32 1.442695, %v237_v42 }
 0x2eb   :  { %1350 = vpow2.f32 %v252_v56 }
 0x2ec   :  { %v1312_v61 = vpop.permute.xlu0 %1311 }
 0x2ed   :  { %v1313_v5 = vunpack.i.l.bf16 %v1312_v61  ;;  %v1314_v0 = vunpack.i.h.bf16 %v1312_v61  ;;  %v415_v61 = vperm.slane %v1504_v13, 1 }
 0x2f1   :  { %v1351_v57 = vpop.eup %1350 }
 0x2f2   :  { %v275_v58 = vsel %vm205_vm2, %v1351_v57, 0.0 }
 0x2f3   :  { %276 = vadd.xlane.f32.xlu0 %v275_v58 }
 0x313   :  { %v256_v60 = vpop.xlane.xlu2 %255 }
 0x314   :  { %1352 = vrcp.f32 %v256_v60 }
 0x31a   :  { %v1353_v4 = vpop.eup %1352 }
 0x31b   :  { %v1307_v63 = vpop.permute.xlu2 %1306  ;;  %v259_v3 = vpop.xlane.xlu0 %258  ;;  %v286_v6 = vmul.f32 %v1353_v4, %v1644_v9 }
 0x31c   :  { %v1308_v1 = vunpack.i.l.bf16 %v1307_v63  ;;  %v1309_v2 = vunpack.i.h.bf16 %v1307_v63  ;;  %1354 = vrcp.f32 %v259_v3 }
 0x31e   :  { %354 = vmatpush.msra.mxu2 %v1308_v1 }
 0x320   :  { %355 = vmatpush.msra.mxu2 %v1309_v2 }
 0x322   :  { %356 = vmatpush.msra.mxu2 %v1313_v5  ;;  %v1355_v8 = vpop.eup %1354 }
 0x323   :  { %v287_v10 = vmul.f32 %v1355_v8, %v1648_v14  ;;  %v1454_v8 = vmov 32.0  }
 0x324   :  { %357 = vmatpush.msra.mxu2 %v1314_v0 }
 0x325   :  { %1237 = vmatmul.msk.f32.vlgmr.msra.gmra.mxu2 %vm205_vm2, %v286_v6 }
 0x32b   :  { %v265_v15 = vpop.xlane.xlu1 %264 }
 0x32d   :  { %1238 = vmatmul.msk.f32.gmra.mxu2 %vm205_vm2, %v287_v10 }
 0x333   :  { %v268_v19 = vpop.xlane.xlu1 %267 }
 0x343   :  { %v274_v25 = vpop.xlane.xlu1 %273 }
 0x354   :  { %v262_v12 = vpop.xlane.xlu2 %261 }
 0x355   :  { %1356 = vrcp.f32 %v262_v12 }
 0x356   :  { %1358 = vrcp.f32 %v265_v15 }
 0x357   :  { %1360 = vrcp.f32 %v268_v19 }
 0x359   :  { %v271_v22 = vpop.xlane.xlu0 %270 }
 0x35a   :  { %1362 = vrcp.f32 %v271_v22 }
 0x35b   :  { %v1357_v16 = vpop.eup %1356  ;;  %1364 = vrcp.f32 %v274_v25 }
 0x35c   :  { %v288_v17 = vmul.f32 %v1357_v16, %v1347_v50  ;;  %v1359_v20 = vpop.eup %1358 }
 0x35d   :  { %v289_v9 = vmul.f32 %v1359_v20, %v1652_v24  ;;  %v1361_v23 = vpop.eup %1360 }
 0x35e   :  { %1239 = vmatmul.msk.f32.gmra.mxu2 %vm205_vm2, %v288_v17  ;;  %v290_v14 = vmul.f32 %v1361_v23, %v1659_v31 }
 0x360   :  { %v1363_v26 = vpop.eup %1362 }
 0x361   :  { %v291_v27 = vmul.f32 %v1363_v26, %v1349_v52  ;;  %v1365_v29 = vpop.eup %1364 }
 0x362   :  { %v292_v24 = vmul.f32 %v1365_v29, %v1663_v39  ;;  %v59_v29 = vld [vmem:[#allocation2 + $0x50] sm:$0xff] }
 0x366   :  { %1240 = vmatmul.msk.f32.gmra.mxu2 %vm205_vm2, %v289_v9  ;;  %v277_v28 = vpop.xlane.xlu0 %276 }
 0x367   :  { %1366 = vrcp.f32 %v277_v28  ;;  %v60_v28 = vld [vmem:[#allocation2 + $0x58] sm:$0xff] }
 0x368   :  { %1368 = vrcp.f32 %v1454_v8  ;;  %523 = vmatpush.msrb.mxu0 %v60_v28  ;;  %v62_v8 = vld [vmem:[#allocation2 + $0x68] sm:$0xff] }
 0x36a   :  { %524 = vmatpush.msrb.mxu0 %v59_v29 }
 0x36d   :  { %v1367_v30 = vpop.eup %1366 }
 0x36e   :  { %1241 = vmatmul.msk.f32.gmra.mxu2 %vm205_vm2, %v290_v14  ;;  %v293_v33 = vmul.f32 %v1367_v30, %v1351_v57  ;;  %v1369_v10 = vpop.eup %1368  ;;  %v57_v30 = vld [vmem:[#allocation2 + $0x40] sm:$0xff] }
 0x36f   :  { %v454_v12 = vmul.f32 32.0, %v1369_v10  ;;  %vm458_vm5 = vweird.f32 %v1369_v10 }
 0x371   :  { %v455_v15 = vsub.f32 1.0, %v454_v12  ;;  %v504_v12 = vperm.slane %v1504_v13, 4 }
 0x373   :  { %v456_v16 = vmul.f32 %v1369_v10, %v455_v15 }
 0x375   :  { %v457_v17 = vadd.f32 %v1369_v10, %v456_v16 }
 0x376   :  { %1242 = vmatmul.msk.f32.gmra.mxu2 %vm205_vm2, %v291_v27 }
 0x377   :  { %v1705_v19 = vsel %vm458_vm5, %v1369_v10, %v457_v17  ;;  %v61_v10 = vld [vmem:[#allocation2 + $0x60] sm:$0xff] }
 0x37e   :  { %1243 = vmatmul.msk.f32.gmra.mxu2 %vm205_vm2, %v292_v24  ;;  %v58_v24 = vld [vmem:[#allocation2 + $0x48] sm:$0xff] }
 0x37f   :  { %525 = vmatpush.msrb.mxu0 %v58_v24 }
 0x381   :  { %526 = vmatpush.msrb.mxu0 %v57_v30 }
 0x386   :  { %1244 = vmatmul.msk.f32.gmra.mxu2 %vm205_vm2, %v293_v33 }
 0x3a8   :  { %v359_v31 = vpop.f32.mrf.mxu2 }
 0x3b0   :  { %v362_v34 = vpop.f32.mrf.mxu2 }
 0x3e1   :  { %v365_v18 = vpop.f32.mrf.mxu2 }
 0x3e2   :  { %385 = vrot.lane.b32.xlu2 %v365_v18, %s1446_s21  ;;  %v68_v18 = vld [vmem:[#allocation2 + $0x98] sm:$0xff] }
 0x3e3   :  { %551 = vmatpush.msrb.mxu3 %v68_v18 }
 0x3e9   :  { %v368_v21 = vpop.f32.mrf.mxu2 }
 0x3ea   :  { %387 = vrot.lane.b32.xlu2 %v368_v21, %s1446_s21  ;;  %v67_v21 = vld [vmem:[#allocation2 + $0x90] sm:$0xff] }
 0x3eb   :  { %552 = vmatpush.msrb.mxu3 %v67_v21 }
 0x3f1   :  { %v371_v35 = vpop.f32.mrf.mxu2 }
 0x3f2   :  { %393 = vrot.lane.b32.xlu1 %v371_v35, %s1452_s1  ;;  %v66_v35 = vld [vmem:[#allocation2 + $0x88] sm:$0xff] }
 0x3f3   :  { %553 = vmatpush.msrb.mxu3 %v66_v35 }
 0x3f9   :  { %v374_v37 = vpop.f32.mrf.mxu2 }
 0x401   :  { %v377_v38 = vpop.f32.mrf.mxu2 }
 0x402   :  { %401 = vrot.lane.b32.xlu0 %v377_v38, %s1453_s24 }
 0x409   :  { %v380_v39 = vpop.f32.mrf.mxu2 }
 0x40a   :  { %395 = vrot.lane.b32.xlu0 %v374_v37, %s1452_s1  ;;  %403 = vrot.lane.b32.xlu1 %v380_v39, %s1453_s24  ;;  %v65_v39 = vld [vmem:[#allocation2 + $0x80] sm:$0xff] }
 0x40b   :  { %554 = vmatpush.msrb.mxu3 %v65_v39  ;;  %v622_v39 = vld [vmem:[#allocation2 + $0xc0] sm:$0xff] }
 0x40c   :  { %659 = vmatpush.msra.mxu0 %v622_v39 }
 0x40d   :  { %555 = vmatpush.msrb.mxu3 %v64_v46 }
 0x43c   :  { %v386_v47 = vpop.permute.xlu2 %385 }
 0x43d   :  { %v407_v50 = vsel %vm131_vm1, %v359_v31, %v386_v47 }
 0x444   :  { %v388_v54 = vpop.permute.xlu2 %387 }
 0x445   :  { %v408_v42 = vsel %vm131_vm1, %v362_v34, %v388_v54  ;;  %v498_v54 = vperm.slane %v1504_v13, 2 }
 0x464   :  { %v394_v48 = vpop.permute.xlu1 %393 }
 0x465   :  { %v410_v51 = vsel %vm409_vm3, %v407_v50, %v394_v48 }
 0x474   :  { %v402_v52 = vpop.permute.xlu0 %401 }
 0x475   :  { %v413_v53 = vsel %vm412_vm4, %v410_v51, %v402_v52 }
 0x476   :  { %1245 = vmatmul.msk.f32.vlgmr.msra.gmra.mxu3 %vm71_vm0, %v413_v53 }
 0x47c   :  { %v396_v56 = vpop.permute.xlu0 %395  ;;  %v404_v57 = vpop.permute.xlu1 %403 }
 0x47d   :  { %v411_v58 = vsel %vm409_vm3, %v408_v42, %v396_v56 }
 0x47e   :  { %v414_v60 = vsel %vm412_vm4, %v411_v58, %v404_v57  ;;  %v501_v58 = vperm.slane %v1504_v13, 3 }
 0x47f   :  { %1246 = vmatmul.msk.f32.gmra.mxu3 %vm71_vm0, %v414_v60 }
 0x4f9   :  { %v439_v63 = vpop.f32.mrf.mxu3 }
 0x4fa   :  { %v440_v1 = vadd.f32 %v439_v63, %v415_v61 }
 0x4fc   :  { %v445_v2 = vadd.f32 %v440_v1, %v1490_v7 }
 0x4fe   :  { %v447_v3 = vsel %vm71_vm0, %v445_v2, 0.0 }
 0x4ff   :  { %448 = vadd.xlane.f32.xlu2 %v447_v3 }
 0x502   :  { %v442_v4 = vpop.f32.mrf.mxu3 }
 0x503   :  { %v443_v5 = vadd.f32 %v442_v4, %v415_v61 }
 0x505   :  { %v446_v0 = vadd.f32 %v443_v5, %v1500_v11 }
 0x507   :  { %v450_v6 = vsel %vm71_vm0, %v446_v0, 0.0 }
 0x508   :  { %451 = vadd.xlane.f32.xlu0 %v450_v6  ;;  %v63_v6 = vld [vmem:[#allocation2 + $0x70] sm:$0xff] }
 0x509   :  { %556 = vmatpush.msrb.mxu3 %v63_v6 }
 0x50b   :  { %557 = vmatpush.msrb.mxu3 %v62_v8 }
 0x50d   :  { %558 = vmatpush.msrb.mxu3 %v61_v10 }
 0x572   :  { %v449_v7 = vpop.xlane.xlu2 %448 }
 0x573   :  { %v460_v20 = vmul.f32 %v1705_v19, %v449_v7 }
 0x575   :  { %v462_v9 = vsub.f32 %v445_v2, %v460_v20 }
 0x577   :  { %v464_v22 = vmul.f32 %v462_v9, %v462_v9 }
 0x579   :  { %v466_v11 = vsel %vm71_vm0, %v464_v22, 0.0  ;;  %v536_v22 = vperm.slane %v1504_v13, 5 }
 0x57a   :  { %467 = vadd.xlane.f32.xlu1 %v466_v11 }
 0x57b   :  { %v452_v23 = vpop.xlane.xlu0 %451 }
 0x57c   :  { %v461_v14 = vmul.f32 %v1705_v19, %v452_v23 }
 0x57e   :  { %v463_v25 = vsub.f32 %v446_v0, %v461_v14 }
 0x580   :  { %v465_v26 = vmul.f32 %v463_v25, %v463_v25 }
 0x582   :  { %v469_v27 = vsel %vm71_vm0, %v465_v26, 0.0 }
 0x583   :  { %470 = vadd.xlane.f32.xlu2 %v469_v27 }
 0x5ed   :  { %v468_v33 = vpop.xlane.xlu1 %467 }
 0x5ee   :  { %v472_v31 = vmul.f32 %v468_v33, %v1705_v19 }
 0x5f0   :  { %v474_v34 = vadd.f32 1e-05, %v472_v31 }
 0x5f2   :  { %1370 = vrsqrt.f32 %v474_v34  ;;  %vm482_vm7 = vweird.f32 %v474_v34 }
 0x5f6   :  { %v471_v37 = vpop.xlane.xlu2 %470 }
 0x5f7   :  { %v473_v38 = vmul.f32 %v471_v37, %v1705_v19 }
 0x5f8   :  { %v1371_v41 = vpop.eup %1370 }
 0x5f9   :  { %v477_v43 = vmul.f32 %v1371_v41, %v474_v34  ;;  %v475_v45 = vadd.f32 1e-05, %v473_v38  ;;  %vm483_vm6 = vweird.f32 %v1371_v41 }
 0x5fa   :  { %vm484_vm8 = vmor %vm482_vm7, %vm483_vm6 }
 0x5fb   :  { %v478_v47 = vmul.f32 %v1371_v41, %v477_v43  ;;  %1372 = vrsqrt.f32 %v475_v45  ;;  %vm492_vm10 = vweird.f32 %v475_v45  ;;  %v620_v43 = vld [vmem:[#allocation2 + $0xb0] sm:$0xff] }
 0x5fd   :  { %v479_v48 = vmul.f32 0.5, %v478_v47 }
 0x5ff   :  { %v480_v50 = vsub.f32 1.5, %v479_v48 }
 0x601   :  { %v1373_v51 = vpop.eup %1372  ;;  %v481_v52 = vmul.f32 %v1371_v41, %v480_v50 }
 0x602   :  { %v487_v53 = vmul.f32 %v1373_v51, %v475_v45  ;;  %vm493_vm9 = vweird.f32 %v1373_v51  ;;  %v619_v45 = vld [vmem:[#allocation2 + $0xa8] sm:$0xff] }
 0x603   :  { %v485_v42 = vsel %vm484_vm8, %v1371_v41, %v481_v52  ;;  %vm494_vm11 = vmor %vm492_vm10, %vm493_vm9  ;;  %v621_v41 = vld [vmem:[#allocation2 + $0xb8] sm:$0xff] }
 0x604   :  { %v496_v56 = vmul.f32 %v485_v42, %v462_v9  ;;  %v488_v57 = vmul.f32 %v1373_v51, %v487_v53  ;;  %660 = vmatpush.msra.mxu0 %v621_v41 }
 0x606   :  { %v489_v60 = vmul.f32 0.5, %v488_v57  ;;  %v499_v61 = vmul.f32 %v498_v54, %v496_v56  ;;  %661 = vmatpush.msra.mxu0 %v620_v43 }
 0x608   :  { %v490_v63 = vsub.f32 1.5, %v489_v60  ;;  %v502_v1 = vadd.f32 %v501_v58, %v499_v61  ;;  %662 = vmatpush.msra.mxu0 %v619_v45  ;;  %v612_v61 = vperm.slane %v1504_v13, 6 }
 0x60a   :  { %v491_v2 = vmul.f32 %v1373_v51, %v490_v63  ;;  %1247 = vmatmul.msk.f32.vlgmr.msrb.gmra.mxu0 %vm71_vm0, %v502_v1 }
 0x60c   :  { %v495_v3 = vsel %vm494_vm11, %v1373_v51, %v491_v2 }
 0x60d   :  { %v497_v4 = vmul.f32 %v495_v3, %v463_v25 }
 0x60f   :  { %v500_v5 = vmul.f32 %v498_v54, %v497_v4  ;;  %v615_v4 = vperm.slane %v1504_v13, 7  ;;  %v1739_v13 = vld [vmem:[#allocation2 + $0x148] sm:$0xff] }
 0x611   :  { %v503_v0 = vadd.f32 %v501_v58, %v500_v5 }
 0x613   :  { %1248 = vmatmul.msk.f32.gmra.mxu0 %vm71_vm0, %v503_v0 }
 0x687   :  { %v528_v15 = vpop.f32.mrf.mxu0 }
 0x688   :  { %v529_v16 = vadd.f32 %v528_v15, %v504_v12 }
 0x68a   :  { %v534_v17 = vmax.f32 %v529_v16, 0.0 }
 0x68c   :  { %1249 = vmatmul.msk.f32.vlgmr.msrb.gmra.mxu3 %vm205_vm2, %v534_v17 }
 0x690   :  { %v531_v7 = vpop.f32.mrf.mxu0 }
 0x691   :  { %v532_v20 = vadd.f32 %v531_v7, %v504_v12  ;;  %v640_v7 = vperm.slane %v1739_v13, 0 }
 0x693   :  { %v535_v9 = vmax.f32 %v532_v20, 0.0 }
 0x695   :  { %1250 = vmatmul.msk.f32.gmra.mxu3 %vm205_vm2, %v535_v9 }
 0x70f   :  { %v560_v11 = vpop.f32.mrf.mxu3 }
 0x710   :  { %v561_v23 = vadd.f32 %v560_v11, %v536_v22 }
 0x712   :  { %v566_v14 = vadd.f32 %v561_v23, %v502_v1 }
 0x714   :  { %v568_v25 = vsel %vm71_vm0, %v566_v14, 0.0 }
 0x715   :  { %569 = vadd.xlane.f32.xlu0 %v568_v25 }
 0x718   :  { %v563_v26 = vpop.f32.mrf.mxu3 }
 0x719   :  { %v564_v27 = vadd.f32 %v563_v26, %v536_v22 }
 0x71b   :  { %v567_v28 = vadd.f32 %v564_v27, %v503_v0 }
 0x71d   :  { %v571_v29 = vsel %vm71_vm0, %v567_v28, 0.0 }
 0x71e   :  { %572 = vadd.xlane.f32.xlu1 %v571_v29 }
 0x788   :  { %v570_v24 = vpop.xlane.xlu0 %569 }
 0x789   :  { %v574_v30 = vmul.f32 %v570_v24, %v1705_v19 }
 0x78b   :  { %v576_v33 = vsub.f32 %v566_v14, %v574_v30 }
 0x78d   :  { %v578_v31 = vmul.f32 %v576_v33, %v576_v33 }
 0x78f   :  { %v580_v34 = vsel %vm71_vm0, %v578_v31, 0.0 }
 0x790   :  { %581 = vadd.xlane.f32.xlu2 %v580_v34 }
 0x791   :  { %v573_v18 = vpop.xlane.xlu1 %572 }
 0x792   :  { %v575_v21 = vmul.f32 %v573_v18, %v1705_v19 }
 0x794   :  { %v577_v35 = vsub.f32 %v567_v28, %v575_v21 }
 0x796   :  { %v579_v37 = vmul.f32 %v577_v35, %v577_v35 }
 0x798   :  { %v583_v38 = vsel %vm71_vm0, %v579_v37, 0.0 }
 0x799   :  { %584 = vadd.xlane.f32.xlu0 %v583_v38 }
 0x803   :  { %v582_v46 = vpop.xlane.xlu2 %581 }
 0x804   :  { %v586_v47 = vmul.f32 %v582_v46, %v1705_v19 }
 0x806   :  { %v588_v48 = vadd.f32 1e-05, %v586_v47 }
 0x808   :  { %1374 = vrsqrt.f32 %v588_v48  ;;  %vm596_vm13 = vweird.f32 %v588_v48 }
 0x80c   :  { %v585_v50 = vpop.xlane.xlu0 %584 }
 0x80d   :  { %v587_v51 = vmul.f32 %v585_v50, %v1705_v19 }
 0x80e   :  { %v1375_v52 = vpop.eup %1374 }
 0x80f   :  { %v591_v53 = vmul.f32 %v1375_v52, %v588_v48  ;;  %v589_v54 = vadd.f32 1e-05, %v587_v51  ;;  %vm597_vm12 = vweird.f32 %v1375_v52 }
 0x810   :  { %vm598_vm14 = vmor %vm596_vm13, %vm597_vm12 }
 0x811   :  { %v592_v42 = vmul.f32 %v1375_v52, %v591_v53  ;;  %1376 = vrsqrt.f32 %v589_v54  ;;  %vm606_vm5 = vweird.f32 %v589_v54 }
 0x813   :  { %v593_v56 = vmul.f32 0.5, %v592_v42 }
 0x815   :  { %v594_v57 = vsub.f32 1.5, %v593_v56 }
 0x817   :  { %v1377_v58 = vpop.eup %1376  ;;  %v595_v60 = vmul.f32 %v1375_v52, %v594_v57 }
 0x818   :  { %v601_v63 = vmul.f32 %v1377_v58, %v589_v54  ;;  %vm607_vm15 = vweird.f32 %v1377_v58 }
 0x819   :  { %v599_v1 = vsel %vm598_vm14, %v1375_v52, %v595_v60  ;;  %vm608_vm6 = vmor %vm606_vm5, %vm607_vm15  ;;  %vm1182_vm15 = vcmask 1040384  }
 0x81a   :  { %v610_v2 = vmul.f32 %v599_v1, %v576_v33  ;;  %v602_v3 = vmul.f32 %v1377_v58, %v601_v63 }
 0x81c   :  { %v613_v5 = vmul.f32 %v612_v61, %v610_v2  ;;  %v603_v0 = vmul.f32 0.5, %v602_v3 }
 0x81e   :  { %v604_v6 = vsub.f32 1.5, %v603_v0  ;;  %v1731_v8 = vadd.f32 %v615_v4, %v613_v5 }
 0x820   :  { %v605_v10 = vmul.f32 %v1377_v58, %v604_v6  ;;  %1251 = vmatmul.msk.f32.vlgmr.msra.gmra.mxu0 %vm71_vm0, %v1731_v8 }
 0x822   :  { %v609_v12 = vsel %vm608_vm6, %v1377_v58, %v605_v10 }
 0x823   :  { %v611_v15 = vmul.f32 %v609_v12, %v577_v35 }
 0x825   :  { %v614_v16 = vmul.f32 %v612_v61, %v611_v15 }
 0x827   :  { %v1735_v17 = vadd.f32 %v615_v4, %v614_v16 }
 0x829   :  { %1252 = vmatmul.msk.f32.gmra.mxu0 %vm71_vm0, %v1735_v17 }
 0x89d   :  { %v664_v20 = vpop.f32.mrf.mxu0 }
 0x89e   :  { %v1742_v9 = vadd.f32 %v664_v20, %v640_v7 }
 0x8a0   :  { %680 = vrot.lane.b32.xlu2 %v1742_v9, %s1449_s30 }
 0x8a6   :  { %v667_v22 = vpop.f32.mrf.mxu0 }
 0x8a7   :  { %v1746_v11 = vadd.f32 %v667_v22, %v640_v7 }
 0x8a8   :  { %672 = vrot.lane.b32.xlu2 %v1742_v9, %s1447_s0 }
 0x8a9   :  { %678 = vrot.lane.b32.xlu0 %v1746_v11, %s1448_s29  ;;  %682 = vrot.lane.b32.xlu1 %v1746_v11, %s1449_s30  ;;  %v1330_v61 = vpack.i.bf16 %v1742_v9, %v1746_v11 }
 0x8b1   :  { %674 = vrot.lane.b32.xlu0 %v1746_v11, %s1447_s0  ;;  %676 = vrot.lane.b32.xlu1 %v1742_v9, %s1448_s29 }
 0x8fa   :  { %v1758_v23 = vpop.permute.xlu2 %680 }
 0x8fb   :  { %696 = vrot.lane.b32.xlu0 %v1758_v23, %s1450_s5 }
 0x902   :  { %v1767_v26 = vpop.permute.xlu2 %672 }
 0x91b   :  { %v679_v14 = vpop.permute.xlu0 %678  ;;  %v1762_v25 = vpop.permute.xlu1 %682 }
 0x91c   :  { %694 = vrot.lane.b32.xlu2 %v679_v14, %s1450_s5  ;;  %698 = vrot.lane.b32.xlu1 %v1762_v25, %s1450_s5  ;;  %v1315_v56 = vpack.i.bf16 %v1758_v23, %v1762_v25 }
 0x923   :  { %v1769_v27 = vpop.permute.xlu0 %674  ;;  %v677_v28 = vpop.permute.xlu1 %676 }
 0x924   :  { %688 = vrot.lane.b32.xlu2 %v1767_v26, %s1450_s5  ;;  %690 = vrot.lane.b32.xlu0 %v1769_v27, %s1450_s5  ;;  %v1320_v53 = vpack.i.bf16 %v677_v28, %v679_v14 }
 0x925   :  { %692 = vrot.lane.b32.xlu1 %v677_v28, %s1450_s5 }
 0x92c   :  { %684 = vrot.lane.b32.xlu0 %v1742_v9, %s1450_s5 }
 0x92d   :  { %686 = vrot.lane.b32.xlu1 %v1746_v11, %s1450_s5 }
 0x96d   :  { %v697_v24 = vpop.permute.xlu0 %696 }
 0x976   :  { %v695_v30 = vpop.permute.xlu2 %694 }
 0x97e   :  { %v689_v34 = vpop.permute.xlu2 %688 }
 0x98e   :  { %v699_v29 = vpop.permute.xlu1 %698 }
 0x98f   :  { %1253 = vmatpush.xpose.msk.msra.mxu3 %vm131_vm1, %v699_v29 }
 0x993   :  { %1254 = vmatpush.xpose.msk.msra.mxu3 %vm131_vm1, %v697_v24 }
 0x996   :  { %v691_v31 = vpop.permute.xlu0 %690 }
 0x997   :  { %1255 = vmatpush.xpose.msk.msra.mxu3 %vm131_vm1, %v695_v30  ;;  %v693_v33 = vpop.permute.xlu1 %692 }
 0x99b   :  { %1256 = vmatpush.xpose.msk.msra.mxu3 %vm131_vm1, %v693_v33 }
 0x99e   :  { %v685_v21 = vpop.permute.xlu0 %684 }
 0x99f   :  { %1257 = vmatpush.xpose.msk.msra.mxu3 %vm131_vm1, %v691_v31  ;;  %v687_v18 = vpop.permute.xlu1 %686 }
 0x9a3   :  { %1258 = vmatpush.xpose.msk.msra.mxu3 %vm131_vm1, %v689_v34 }
 0x9a7   :  { %1259 = vmatpush.xpose.msk.msra.mxu3 %vm131_vm1, %v687_v18 }
 0x9ab   :  { %1260 = vmatpush.xpose.msk.msra.mxu3 %vm131_vm1, %v685_v21 }
 0x9ae   :  { %1261 = vmatmul.msk.f32.vlgmr.msra.gmra.mxu3 %vm131_vm1, %v1742_v9 }
 0x9b6   :  { %1262 = vmatmul.msk.f32.gmra.mxu3 %vm131_vm1, %v1746_v11 }
 0x9be   :  { %1263 = vmatmul.msk.f32.gmra.mxu3 %vm131_vm1, %v1767_v26 }
 0x9c6   :  { %1264 = vmatmul.msk.f32.gmra.mxu3 %vm131_vm1, %v1769_v27 }
 0x9ce   :  { %1265 = vmatmul.msk.f32.gmra.mxu3 %vm131_vm1, %v677_v28  ;;  %v1325_v28 = vpack.i.bf16 %v1767_v26, %v1769_v27 }
 0x9d6   :  { %1266 = vmatmul.msk.f32.gmra.mxu3 %vm131_vm1, %v679_v14 }
 0x9de   :  { %1267 = vmatmul.msk.f32.gmra.mxu3 %vm131_vm1, %v1758_v23 }
 0x9e6   :  { %1268 = vmatmul.msk.f32.gmra.mxu3 %vm131_vm1, %v1762_v25 }
 0xa31   :  { %v749_v35 = vpop.f32.mrf.mxu3 }
 0xa32   :  { %v750_v37 = vadd.f32 %v749_v35, %v1574_v32 }
 0xa34   :  { %v773_v38 = vsel %vm205_vm2, %v750_v37, -inf }
 0xa35   :  { %774 = vmax.xlane.f32.xlu2 %v773_v38 }
 0xa39   :  { %v752_v39 = vpop.f32.mrf.mxu3 }
 0xa3a   :  { %v753_v41 = vadd.f32 %v752_v39, %v1581_v36 }
 0xa3c   :  { %v776_v43 = vsel %vm205_vm2, %v753_v41, -inf }
 0xa3d   :  { %777 = vmax.xlane.f32.xlu1 %v776_v43 }
 0xa41   :  { %v755_v45 = vpop.f32.mrf.mxu3 }
 0xa42   :  { %v1807_v46 = vadd.f32 %v755_v45, %v1588_v40 }
 0xa44   :  { %v779_v47 = vsel %vm205_vm2, %v1807_v46, -inf }
 0xa45   :  { %780 = vmax.xlane.f32.xlu0 %v779_v47 }
 0xa49   :  { %v758_v48 = vpop.f32.mrf.mxu3 }
 0xa4a   :  { %v759_v32 = vadd.f32 %v758_v48, %v1598_v44 }
 0xa4c   :  { %v782_v50 = vsel %vm205_vm2, %v759_v32, -inf }
 0xa4d   :  { %783 = vmax.xlane.f32.xlu2 %v782_v50 }
 0xa51   :  { %v761_v51 = vpop.f32.mrf.mxu3 }
 0xa52   :  { %v762_v36 = vadd.f32 %v761_v51, %v1606_v49 }
 0xa54   :  { %v785_v52 = vsel %vm205_vm2, %v762_v36, -inf }
 0xa55   :  { %786 = vmax.xlane.f32.xlu1 %v785_v52 }
 0xa59   :  { %v764_v54 = vpop.f32.mrf.mxu3  ;;  %1321 = vrot.lane.b32.xlu0 %v1320_v53, %s1451_s16 }
 0xa5a   :  { %v1822_v49 = vadd.f32 %v764_v54, %v1624_v59 }
 0xa5c   :  { %v788_v57 = vsel %vm205_vm2, %v1822_v49, -inf }
 0xa61   :  { %v767_v40 = vpop.f32.mrf.mxu3 }
 0xa62   :  { %v768_v42 = vadd.f32 %v767_v40, %v1617_v55 }
 0xa64   :  { %v791_v44 = vsel %vm205_vm2, %v768_v42, -inf }
 0xa65   :  { %792 = vmax.xlane.f32.xlu1 %v791_v44  ;;  %1316 = vrot.lane.b32.xlu2 %v1315_v56, %s1451_s16 }
 0xa69   :  { %v770_v58 = vpop.f32.mrf.mxu3 }
 0xa6a   :  { %v1827_v60 = vadd.f32 %v770_v58, %v1634_v62 }
 0xa6c   :  { %v794_v55 = vsel %vm205_vm2, %v1827_v60, -inf }
 0xa83   :  { %789 = vmax.xlane.f32.xlu0 %v788_v57 }
 0xa8e   :  { %795 = vmax.xlane.f32.xlu2 %v794_v55 }
 0xa97   :  { %1331 = vrot.lane.b32.xlu0 %v1330_v61, %s1451_s16 }
 0xaa8   :  { %v775_v63 = vpop.xlane.xlu2 %774 }
 0xaa9   :  { %v797_v59 = vsub.f32 %v750_v37, %v775_v63 }
 0xaab   :  { %v805_v1 = vmul.f32 1.442695, %v797_v59 }
 0xaad   :  { %1378 = vpow2.f32 %v805_v1 }
 0xab0   :  { %v778_v2 = vpop.xlane.xlu1 %777 }
 0xab1   :  { %v798_v3 = vsub.f32 %v753_v41, %v778_v2 }
 0xab3   :  { %v1834_v4 = vpop.eup %1378  ;;  %v807_v5 = vmul.f32 1.442695, %v798_v3 }
 0xab4   :  { %v821_v62 = vsel %vm205_vm2, %v1834_v4, 0.0 }
 0xab5   :  { %822 = vadd.xlane.f32.xlu1 %v821_v62  ;;  %1380 = vpow2.f32 %v807_v5 }
 0xab8   :  { %v781_v15 = vpop.xlane.xlu0 %780 }
 0xab9   :  { %v799_v35 = vsub.f32 %v1807_v46, %v781_v15 }
 0xabb   :  { %v1838_v0 = vpop.eup %1380  ;;  %v809_v37 = vmul.f32 1.442695, %v799_v35 }
 0xabc   :  { %v824_v10 = vsel %vm205_vm2, %v1838_v0, 0.0 }
 0xac0   :  { %v784_v6 = vpop.xlane.xlu2 %783 }
 0xac1   :  { %v800_v12 = vsub.f32 %v759_v32, %v784_v6  ;;  %825 = vadd.xlane.f32.xlu0 %v824_v10 }
 0xac3   :  { %v811_v16 = vmul.f32 1.442695, %v800_v12 }
 0xac5   :  { %1382 = vpow2.f32 %v811_v16 }
 0xac8   :  { %v787_v7 = vpop.xlane.xlu1 %786  ;;  %v1317_v20 = vpop.permute.xlu2 %1316 }
 0xac9   :  { %v801_v9 = vsub.f32 %v762_v36, %v787_v7  ;;  %v1318_v22 = vunpack.i.l.bf16 %v1317_v20  ;;  %v1319_v14 = vunpack.i.h.bf16 %v1317_v20 }
 0xacb   :  { %v1842_v11 = vpop.eup %1382  ;;  %v813_v23 = vmul.f32 1.442695, %v801_v9  ;;  %v1322_v25 = vpop.permute.xlu0 %1321  ;;  %917 = vmatpush.msrb.mxu0 %v1318_v22 }
 0xacc   :  { %v1323_v29 = vunpack.i.l.bf16 %v1322_v25  ;;  %v830_v24 = vsel %vm205_vm2, %v1842_v11, 0.0  ;;  %v1324_v30 = vunpack.i.h.bf16 %v1322_v25  ;;  %v626_v25 = vld [vmem:[#allocation2 + $0xe0] sm:$0xff] }
 0xacd   :  { %1384 = vpow2.f32 %v813_v23  ;;  %831 = vadd.xlane.f32.xlu2 %v830_v24  ;;  %918 = vmatpush.msrb.mxu0 %v1319_v14 }
 0xace   :  { %1326 = vrot.lane.b32.xlu1 %v1325_v28, %s1451_s16  ;;  %999 = vmatpush.msrb.mxu2 %v626_v25  ;;  %v1056_v25 = vperm.slane %v1739_v13, 2 }
 0xacf   :  { %919 = vmatpush.msrb.mxu0 %v1323_v29 }
 0xad1   :  { %920 = vmatpush.msrb.mxu0 %v1324_v30 }
 0xad3   :  { %v1849_v33 = vpop.eup %1384 }
 0xad4   :  { %v833_v31 = vsel %vm205_vm2, %v1849_v33, 0.0 }
 0xad5   :  { %834 = vadd.xlane.f32.xlu2 %v833_v31  ;;  %v624_v31 = vld [vmem:[#allocation2 + $0xd0] sm:$0xff] }
 0xad8   :  { %v793_v34 = vpop.xlane.xlu1 %792 }
 0xad9   :  { %v803_v26 = vsub.f32 %v768_v42, %v793_v34  ;;  %v623_v34 = vld [vmem:[#allocation2 + $0xc8] sm:$0xff] }
 0xadb   :  { %v817_v27 = vmul.f32 1.442695, %v803_v26 }
 0xadd   :  { %1386 = vpow2.f32 %v817_v27 }
 0xade   :  { %1388 = vpow2.f32 %v809_v37 }
 0xae3   :  { %v1853_v18 = vpop.eup %1386 }
 0xae4   :  { %v839_v21 = vsel %vm205_vm2, %v1853_v18, 0.0  ;;  %v1389_v38 = vpop.eup %1388 }
 0xae5   :  { %840 = vadd.xlane.f32.xlu2 %v839_v21  ;;  %v827_v43 = vsel %vm205_vm2, %v1389_v38, 0.0 }
 0xaf6   :  { %v790_v39 = vpop.xlane.xlu0 %789 }
 0xaf7   :  { %v802_v41 = vsub.f32 %v1822_v49, %v790_v39 }
 0xaf8   :  { %828 = vadd.xlane.f32.xlu1 %v827_v43 }
 0xaf9   :  { %v815_v45 = vmul.f32 1.442695, %v802_v41 }
 0xafb   :  { %1390 = vpow2.f32 %v815_v45 }
 0xb01   :  { %v1391_v47 = vpop.eup %1390  ;;  %v796_v48 = vpop.xlane.xlu2 %795 }
 0xb02   :  { %v804_v32 = vsub.f32 %v1827_v60, %v796_v48  ;;  %v836_v50 = vsel %vm205_vm2, %v1391_v47, 0.0  ;;  %v980_v48 = vperm.slane %v1739_v13, 1 }
 0xb03   :  { %837 = vadd.xlane.f32.xlu0 %v836_v50 }
 0xb04   :  { %v819_v51 = vmul.f32 1.442695, %v804_v32 }
 0xb06   :  { %1392 = vpow2.f32 %v819_v51 }
 0xb09   :  { %v1332_v53 = vpop.permute.xlu0 %1331 }
 0xb0a   :  { %v1333_v49 = vunpack.i.l.bf16 %v1332_v53  ;;  %v1334_v57 = vunpack.i.h.bf16 %v1332_v53 }
 0xb0c   :  { %v1393_v46 = vpop.eup %1392 }
 0xb0d   :  { %v842_v36 = vsel %vm205_vm2, %v1393_v46, 0.0 }
 0xb0e   :  { %843 = vadd.xlane.f32.xlu0 %v842_v36 }
 0xb28   :  { %v823_v52 = vpop.xlane.xlu1 %822 }
 0xb29   :  { %1394 = vrcp.f32 %v823_v52 }
 0xb2f   :  { %v1395_v44 = vpop.eup %1394 }
 0xb30   :  { %v853_v58 = vmul.f32 %v1395_v44, %v1834_v4 }
 0xb34   :  { %v826_v56 = vpop.xlane.xlu0 %825 }
 0xb35   :  { %1396 = vrcp.f32 %v826_v56  ;;  %v628_v56 = vld [vmem:[#allocation2 + $0xf0] sm:$0xff] }
 0xb3b   :  { %v1397_v60 = vpop.eup %1396 }
 0xb3c   :  { %v854_v55 = vmul.f32 %v1397_v60, %v1838_v0 }
 0xb40   :  { %v1327_v54 = vpop.permute.xlu1 %1326  ;;  %v832_v63 = vpop.xlane.xlu2 %831 }
 0xb41   :  { %v1328_v40 = vunpack.i.l.bf16 %v1327_v54  ;;  %v1329_v42 = vunpack.i.h.bf16 %v1327_v54 }
 0xb43   :  { %921 = vmatpush.msrb.mxu0 %v1328_v40  ;;  %v630_v40 = vld [vmem:[#allocation2 + $0x100] sm:$0xff] }
 0xb44   :  { %1081 = vmatpush.msrb.mxu1 %v630_v40 }
 0xb45   :  { %922 = vmatpush.msrb.mxu0 %v1329_v42  ;;  %v629_v42 = vld [vmem:[#allocation2 + $0xf8] sm:$0xff] }
 0xb46   :  { %1082 = vmatpush.msrb.mxu1 %v629_v42 }
 0xb47   :  { %923 = vmatpush.msrb.mxu0 %v1333_v49 }
 0xb48   :  { %v835_v2 = vpop.xlane.xlu2 %834  ;;  %1083 = vmatpush.msrb.mxu1 %v628_v56 }
 0xb49   :  { %924 = vmatpush.msrb.mxu0 %v1334_v57 }
 0xb4a   :  { %1269 = vmatmul.msk.f32.vlgmr.msrb.gmra.mxu0 %vm205_vm2, %v853_v58 }
 0xb52   :  { %1270 = vmatmul.msk.f32.gmra.mxu0 %vm205_vm2, %v854_v55 }
 0xb58   :  { %v841_v6 = vpop.xlane.xlu2 %840 }
 0xb6b   :  { %v829_v61 = vpop.xlane.xlu1 %828 }
 0xb6c   :  { %1398 = vrcp.f32 %v829_v61 }
 0xb6d   :  { %1400 = vrcp.f32 %v832_v63 }
 0xb6e   :  { %1402 = vrcp.f32 %v835_v2 }
 0xb72   :  { %v1399_v59 = vpop.eup %1398 }
 0xb73   :  { %v855_v1 = vmul.f32 %v1399_v59, %v1389_v38  ;;  %v1401_v3 = vpop.eup %1400  ;;  %v627_v59 = vld [vmem:[#allocation2 + $0xe8] sm:$0xff] }
 0xb74   :  { %v856_v4 = vmul.f32 %v1401_v3, %v1842_v11  ;;  %v1403_v62 = vpop.eup %1402  ;;  %1084 = vmatpush.msrb.mxu1 %v627_v59 }
 0xb75   :  { %1271 = vmatmul.msk.f32.gmra.mxu0 %vm205_vm2, %v855_v1  ;;  %v857_v0 = vmul.f32 %v1403_v62, %v1849_v33  ;;  %v625_v33 = vld [vmem:[#allocation2 + $0xd8] sm:$0xff]  ;;  %v636_v62 = vld [vmem:[#allocation2 + $0x130] sm:$0xff] }
 0xb76   :  { %v838_v5 = vpop.xlane.xlu0 %837  ;;  %1000 = vmatpush.msrb.mxu2 %v625_v33 }
 0xb77   :  { %1404 = vrcp.f32 %v838_v5  ;;  %v637_v5 = vld [vmem:[#allocation2 + $0x138] sm:$0xff] }
 0xb78   :  { %1406 = vrcp.f32 %v841_v6  ;;  %1001 = vmatpush.msrb.mxu2 %v624_v31 }
 0xb7a   :  { %1002 = vmatpush.msrb.mxu2 %v623_v34 }
 0xb7d   :  { %1272 = vmatmul.msk.f32.gmra.mxu0 %vm205_vm2, %v856_v4  ;;  %v1405_v10 = vpop.eup %1404  ;;  %v638_v4 = vld [vmem:[#allocation2 + $0x140] sm:$0xff] }
 0xb7e   :  { %v858_v12 = vmul.f32 %v1405_v10, %v1391_v47  ;;  %v1407_v16 = vpop.eup %1406  ;;  %1109 = vmatpush.msra.mxu2 %v638_v4  ;;  %v635_v10 = vld [vmem:[#allocation2 + $0x128] sm:$0xff]  ;;  %v1186_v4 = vld [vmem:[%s1941_s3 + $0x10] sm:$0xff] }
 0xb7f   :  { %v859_v7 = vmul.f32 %v1407_v16, %v1853_v18 }
 0xb80   :  { %1110 = vmatpush.msra.mxu2 %v637_v5 }
 0xb81   :  { %v844_v15 = vpop.xlane.xlu0 %843 }
 0xb82   :  { %1408 = vrcp.f32 %v844_v15  ;;  %1111 = vmatpush.msra.mxu2 %v636_v62  ;;  %v1185_v62 = vld [vmem:[%s1941_s3 + $0x8] sm:$0xff] }
 0xb84   :  { %1112 = vmatpush.msra.mxu2 %v635_v10 }
 0xb85   :  { %1273 = vmatmul.msk.f32.gmra.mxu0 %vm205_vm2, %v857_v0 }
 0xb88   :  { %v1409_v20 = vpop.eup %1408 }
 0xb89   :  { %v860_v9 = vmul.f32 %v1409_v20, %v1393_v46 }
 0xb8d   :  { %1274 = vmatmul.msk.f32.gmra.mxu0 %vm205_vm2, %v858_v12 }
 0xb95   :  { %1275 = vmatmul.msk.f32.gmra.mxu0 %vm205_vm2, %v859_v7  ;;  %v634_v7 = vld [vmem:[#allocation2 + $0x120] sm:$0xff] }
 0xb96   :  { %1113 = vmatpush.msra.mxu2 %v634_v7 }
 0xb9d   :  { %1276 = vmatmul.msk.f32.gmra.mxu0 %vm205_vm2, %v860_v9 }
 0xbc7   :  { %v926_v22 = vpop.f32.mrf.mxu0 }
 0xbcf   :  { %v929_v11 = vpop.f32.mrf.mxu0 }
 0xbf2   :  { %v932_v23 = vpop.f32.mrf.mxu0 }
 0xbf3   :  { %952 = vrot.lane.b32.xlu2 %v932_v23, %s1446_s21 }
 0xbfa   :  { %v935_v14 = vpop.f32.mrf.mxu0 }
 0xbfb   :  { %954 = vrot.lane.b32.xlu2 %v935_v14, %s1446_s21 }
 0xc02   :  { %v938_v28 = vpop.f32.mrf.mxu0 }
 0xc03   :  { %960 = vrot.lane.b32.xlu1 %v938_v28, %s1452_s1 }
 0xc0a   :  { %v941_v29 = vpop.f32.mrf.mxu0 }
 0xc12   :  { %v944_v24 = vpop.f32.mrf.mxu0 }
 0xc13   :  { %968 = vrot.lane.b32.xlu0 %v944_v24, %s1453_s24 }
 0xc1a   :  { %v947_v30 = vpop.f32.mrf.mxu0 }
 0xc1b   :  { %962 = vrot.lane.b32.xlu0 %v941_v29, %s1452_s1  ;;  %970 = vrot.lane.b32.xlu1 %v947_v30, %s1453_s24  ;;  %v1059_v30 = vperm.slane %v1739_v13, 3 }
 0xc4d   :  { %v953_v26 = vpop.permute.xlu2 %952 }
 0xc4e   :  { %v974_v18 = vsel %vm131_vm1, %v926_v22, %v953_v26 }
 0xc55   :  { %v955_v38 = vpop.permute.xlu2 %954 }
 0xc56   :  { %v975_v39 = vsel %vm131_vm1, %v929_v11, %v955_v38  ;;  %v633_v38 = vld [vmem:[#allocation2 + $0x118] sm:$0xff] }
 0xc57   :  { %1114 = vmatpush.msra.mxu2 %v633_v38 }
 0xc75   :  { %v961_v27 = vpop.permute.xlu1 %960 }
 0xc76   :  { %v976_v21 = vsel %vm409_vm3, %v974_v18, %v961_v27 }
 0xc85   :  { %v969_v35 = vpop.permute.xlu0 %968 }
 0xc86   :  { %v978_v37 = vsel %vm412_vm4, %v976_v21, %v969_v35 }
 0xc87   :  { %1277 = vmatmul.msk.f32.vlgmr.msrb.gmra.mxu2 %vm71_vm0, %v978_v37 }
 0xc8d   :  { %v963_v41 = vpop.permute.xlu0 %962  ;;  %v971_v43 = vpop.permute.xlu1 %970 }
 0xc8e   :  { %v977_v45 = vsel %vm409_vm3, %v975_v39, %v963_v41  ;;  %v632_v39 = vld [vmem:[#allocation2 + $0x110] sm:$0xff]  ;;  %v631_v41 = vld [vmem:[#allocation2 + $0x108] sm:$0xff] }
 0xc8f   :  { %v979_v47 = vsel %vm412_vm4, %v977_v45, %v971_v43  ;;  %1115 = vmatpush.msra.mxu2 %v632_v39  ;;  %v1062_v43 = vperm.slane %v1739_v13, 4  ;;  %v1335_v39 = vld [vmem:[%s1941_s3 + $0x20] ss:$0 sm:$0xff] }
 0xc90   :  { %1278 = vmatmul.msk.f32.gmra.mxu2 %vm71_vm0, %v979_v47 }
 0xc91   :  { %1116 = vmatpush.msra.mxu2 %v631_v41 }
 0xd0a   :  { %v1004_v32 = vpop.f32.mrf.mxu2 }
 0xd0b   :  { %v1005_v50 = vadd.f32 %v1004_v32, %v980_v48 }
 0xd0d   :  { %v1010_v51 = vadd.f32 %v1005_v50, %v1731_v8 }
 0xd0f   :  { %v1012_v46 = vsel %vm71_vm0, %v1010_v51, 0.0 }
 0xd10   :  { %1013 = vadd.xlane.f32.xlu2 %v1012_v46  ;;  %v1094_v46 = vperm.slane %v1739_v13, 5 }
 0xd13   :  { %v1007_v36 = vpop.f32.mrf.mxu2 }
 0xd14   :  { %v1008_v52 = vadd.f32 %v1007_v36, %v980_v48 }
 0xd16   :  { %v1011_v53 = vadd.f32 %v1008_v52, %v1735_v17 }
 0xd18   :  { %v1015_v54 = vsel %vm71_vm0, %v1011_v53, 0.0 }
 0xd19   :  { %1016 = vadd.xlane.f32.xlu0 %v1015_v54 }
 0xd83   :  { %v1014_v44 = vpop.xlane.xlu2 %1013 }
 0xd84   :  { %v1018_v49 = vmul.f32 %v1014_v44, %v1705_v19 }
 0xd86   :  { %v1020_v8 = vsub.f32 %v1010_v51, %v1018_v49 }
 0xd88   :  { %v1022_v57 = vmul.f32 %v1020_v8, %v1020_v8 }
 0xd8a   :  { %v1024_v58 = vsel %vm71_vm0, %v1022_v57, 0.0 }
 0xd8b   :  { %1025 = vadd.xlane.f32.xlu1 %v1024_v58 }
 0xd8c   :  { %v1017_v60 = vpop.xlane.xlu0 %1016 }
 0xd8d   :  { %v1019_v17 = vmul.f32 %v1017_v60, %v1705_v19 }
 0xd8f   :  { %v1021_v55 = vsub.f32 %v1011_v53, %v1019_v17 }
 0xd91   :  { %v1023_v61 = vmul.f32 %v1021_v55, %v1021_v55 }
 0xd93   :  { %v1027_v63 = vsel %vm71_vm0, %v1023_v61, 0.0 }
 0xd94   :  { %1028 = vadd.xlane.f32.xlu2 %v1027_v63 }
 0xdfe   :  { %v1026_v1 = vpop.xlane.xlu1 %1025 }
 0xdff   :  { %v1030_v2 = vmul.f32 %v1026_v1, %v1705_v19 }
 0xe01   :  { %v1032_v3 = vadd.f32 1e-05, %v1030_v2 }
 0xe03   :  { %1410 = vrsqrt.f32 %v1032_v3  ;;  %vm1040_vm3 = vweird.f32 %v1032_v3 }
 0xe07   :  { %v1029_v0 = vpop.xlane.xlu2 %1028 }
 0xe08   :  { %v1031_v6 = vmul.f32 %v1029_v0, %v1705_v19  ;;  %v1184_v0 = vld [vmem:[%s1941_s3] sm:$0xff] }
 0xe09   :  { %v1411_v12 = vpop.eup %1410 }
 0xe0a   :  { %v1035_v15 = vmul.f32 %v1411_v12, %v1032_v3  ;;  %v1033_v16 = vadd.f32 1e-05, %v1031_v6  ;;  %vm1041_vm1 = vweird.f32 %v1411_v12  ;;  %v1187_v3 = vld [vmem:[%s1941_s3 + $0x18] sm:$0xff] }
 0xe0b   :  { %vm1042_vm4 = vmor %vm1040_vm3, %vm1041_vm1  ;;  %1205 = vmatpush.msra.mxu1 %v1187_v3 }
 0xe0c   :  { %v1036_v20 = vmul.f32 %v1411_v12, %v1035_v15  ;;  %1412 = vrsqrt.f32 %v1033_v16  ;;  %vm1050_vm8 = vweird.f32 %v1033_v16 }
 0xe0d   :  { %1206 = vmatpush.msra.mxu1 %v1186_v4 }
 0xe0e   :  { %v1037_v9 = vmul.f32 0.5, %v1036_v20 }
 0xe0f   :  { %1207 = vmatpush.msra.mxu1 %v1185_v62 }
 0xe10   :  { %v1038_v22 = vsub.f32 1.5, %v1037_v9 }
 0xe11   :  { %1208 = vmatpush.msra.mxu1 %v1184_v0 }
 0xe12   :  { %v1413_v11 = vpop.eup %1412  ;;  %v1039_v23 = vmul.f32 %v1411_v12, %v1038_v22 }
 0xe13   :  { %v1045_v14 = vmul.f32 %v1413_v11, %v1033_v16  ;;  %vm1051_vm7 = vweird.f32 %v1413_v11 }
 0xe14   :  { %v1043_v28 = vsel %vm1042_vm4, %v1411_v12, %v1039_v23  ;;  %vm1052_vm9 = vmor %vm1050_vm8, %vm1051_vm7 }
 0xe15   :  { %v1054_v29 = vmul.f32 %v1043_v28, %v1020_v8  ;;  %v1046_v24 = vmul.f32 %v1413_v11, %v1045_v14 }
 0xe17   :  { %v1047_v33 = vmul.f32 0.5, %v1046_v24  ;;  %v1057_v31 = vmul.f32 %v1056_v25, %v1054_v29  ;;  %v1170_v29 = vperm.slane %v1739_v13, 6 }
 0xe19   :  { %v1048_v34 = vsub.f32 1.5, %v1047_v33  ;;  %v1060_v26 = vadd.f32 %v1059_v30, %v1057_v31  ;;  %v1173_v31 = vperm.slane %v1739_v13, 7 }
 0xe1b   :  { %v1049_v27 = vmul.f32 %v1413_v11, %v1048_v34  ;;  %1279 = vmatmul.msk.f32.vlgmr.msrb.gmra.mxu1 %vm71_vm0, %v1060_v26 }
 0xe1d   :  { %v1053_v18 = vsel %vm1052_vm9, %v1413_v11, %v1049_v27 }
 0xe1e   :  { %v1055_v21 = vmul.f32 %v1053_v18, %v1021_v55 }
 0xe20   :  { %v1058_v35 = vmul.f32 %v1056_v25, %v1055_v21 }
 0xe22   :  { %v1061_v37 = vadd.f32 %v1059_v30, %v1058_v35 }
 0xe24   :  { %1280 = vmatmul.msk.f32.gmra.mxu1 %vm71_vm0, %v1061_v37 }
 0xe98   :  { %v1086_v45 = vpop.f32.mrf.mxu1 }
 0xe99   :  { %v1087_v47 = vadd.f32 %v1086_v45, %v1062_v43 }
 0xe9b   :  { %v1092_v48 = vmax.f32 %v1087_v47, 0.0 }
 0xe9d   :  { %1281 = vmatmul.msk.f32.vlgmr.msra.gmra.mxu2 %vm205_vm2, %v1092_v48 }
 0xea1   :  { %v1089_v32 = vpop.f32.mrf.mxu1 }
 0xea2   :  { %v1090_v50 = vadd.f32 %v1089_v32, %v1062_v43 }
 0xea4   :  { %v1093_v51 = vmax.f32 %v1090_v50, 0.0 }
 0xea6   :  { %1282 = vmatmul.msk.f32.gmra.mxu2 %vm205_vm2, %v1093_v51 }
 0xf20   :  { %v1118_v36 = vpop.f32.mrf.mxu2 }
 0xf21   :  { %v1119_v52 = vadd.f32 %v1118_v36, %v1094_v46 }
 0xf23   :  { %v1124_v53 = vadd.f32 %v1119_v52, %v1060_v26 }
 0xf25   :  { %v1126_v54 = vsel %vm71_vm0, %v1124_v53, 0.0 }
 0xf26   :  { %1127 = vadd.xlane.f32.xlu0 %v1126_v54 }
 0xf29   :  { %v1121_v40 = vpop.f32.mrf.mxu2 }
 0xf2a   :  { %v1122_v42 = vadd.f32 %v1121_v40, %v1094_v46 }
 0xf2c   :  { %v1125_v56 = vadd.f32 %v1122_v42, %v1061_v37 }
 0xf2e   :  { %v1129_v44 = vsel %vm71_vm0, %v1125_v56, 0.0 }
 0xf2f   :  { %1130 = vadd.xlane.f32.xlu1 %v1129_v44 }
 0xf99   :  { %v1128_v49 = vpop.xlane.xlu0 %1127 }
 0xf9a   :  { %v1132_v8 = vmul.f32 %v1128_v49, %v1705_v19 }
 0xf9c   :  { %v1134_v57 = vsub.f32 %v1124_v53, %v1132_v8 }
 0xf9e   :  { %v1136_v58 = vmul.f32 %v1134_v57, %v1134_v57 }
 0xfa0   :  { %v1138_v60 = vsel %vm71_vm0, %v1136_v58, 0.0 }
 0xfa1   :  { %1139 = vadd.xlane.f32.xlu2 %v1138_v60 }
 0xfa2   :  { %v1131_v17 = vpop.xlane.xlu1 %1130 }
 0xfa3   :  { %v1133_v55 = vmul.f32 %v1131_v17, %v1705_v19 }
 0xfa5   :  { %v1135_v61 = vsub.f32 %v1125_v56, %v1133_v55 }
 0xfa7   :  { %v1137_v63 = vmul.f32 %v1135_v61, %v1135_v61 }
 0xfa9   :  { %v1141_v59 = vsel %vm71_vm0, %v1137_v63, 0.0 }
 0xfaa   :  { %1142 = vadd.xlane.f32.xlu0 %v1141_v59 }
0x1014   :  { %v1140_v1 = vpop.xlane.xlu2 %1139 }
0x1015   :  { %v1144_v2 = vmul.f32 %v1140_v1, %v1705_v19 }
0x1017   :  { %v1146_v5 = vadd.f32 1e-05, %v1144_v2 }
0x1019   :  { %1414 = vrsqrt.f32 %v1146_v5  ;;  %vm1154_vm10 = vweird.f32 %v1146_v5 }
0x101d   :  { %v1143_v6 = vpop.xlane.xlu0 %1142 }
0x101e   :  { %v1145_v10 = vmul.f32 %v1143_v6, %v1705_v19 }
0x101f   :  { %v1415_v12 = vpop.eup %1414 }
0x1020   :  { %v1149_v15 = vmul.f32 %v1415_v12, %v1146_v5  ;;  %v1147_v16 = vadd.f32 1e-05, %v1145_v10  ;;  %vm1155_vm2 = vweird.f32 %v1415_v12 }
0x1021   :  { %vm1156_vm11 = vmor %vm1154_vm10, %vm1155_vm2 }
0x1022   :  { %v1150_v7 = vmul.f32 %v1415_v12, %v1149_v15  ;;  %1416 = vrsqrt.f32 %v1147_v16  ;;  %vm1164_vm13 = vweird.f32 %v1147_v16 }
0x1024   :  { %v1151_v20 = vmul.f32 0.5, %v1150_v7 }
0x1026   :  { %v1152_v9 = vsub.f32 1.5, %v1151_v20 }
0x1028   :  { %v1417_v22 = vpop.eup %1416  ;;  %v1153_v11 = vmul.f32 %v1415_v12, %v1152_v9 }
0x1029   :  { %v1159_v23 = vmul.f32 %v1417_v22, %v1147_v16  ;;  %vm1165_vm12 = vweird.f32 %v1417_v22 }
0x102a   :  { %v1157_v14 = vsel %vm1156_vm11, %v1415_v12, %v1153_v11  ;;  %vm1166_vm14 = vmor %vm1164_vm13, %vm1165_vm12 }
0x102b   :  { %v1160_v25 = vmul.f32 %v1417_v22, %v1159_v23  ;;  %v1168_v24 = vmul.f32 %v1157_v14, %v1134_v57 }
0x102d   :  { %v1161_v28 = vmul.f32 0.5, %v1160_v25  ;;  %v1171_v33 = vmul.f32 %v1170_v29, %v1168_v24 }
0x102f   :  { %v1162_v19 = vsub.f32 1.5, %v1161_v28  ;;  %v1174_v18 = vadd.f32 %v1173_v31, %v1171_v33 }
0x1031   :  { %v1163_v30 = vmul.f32 %v1417_v22, %v1162_v19  ;;  %v1177_v35 = vrot.slane %v1174_v18, 7 }
0x1033   :  { %v1167_v34 = vsel %vm1166_vm14, %v1417_v22, %v1163_v30 }
0x1034   :  { %v1169_v26 = vmul.f32 %v1167_v34, %v1135_v61 }
0x1036   :  { %v1172_v27 = vmul.f32 %v1170_v29, %v1169_v26 }
0x1038   :  { %v1175_v21 = vadd.f32 %v1173_v31, %v1172_v27 }
0x103a   :  { %v1180_v37 = vrot.slane %v1175_v21, 6 }
0x103c   :  { %v1183_v38 = vsel %vm1182_vm15, %v1177_v35, %v1180_v37 }
0x103d   :  { %1283 = vmatmul.msk.f32.vlgmr.msra.gmra.mxu1 %vm71_vm0, %v1183_v38 }
0x10ba   :  { %v1210_v41 = vpop.f32.mrf.mxu1 }
0x10bb   :  { %v1211_v43 = vadd.f32 %v1335_v39, %v1210_v41 }
0x10bd   :  { %1213 = vst [vmem:[%s1942_s4] sm:$0x3] %v1211_v43 }
0x10be   :  { %1218 = vsyncpa [#allocation3], 1 }

</bundles_post_ra>
